<compile_context>
chip_gen: v6e
topology: v6e:2x2x1
jax: 0.10.0
libtpu: 0.0.40
codegen_flags: <defaults>
</compile_context>

<pallas_src>
import math
import functools

import jax
import jax.numpy as jnp
from jax.experimental import pallas as pl
from jax.experimental.pallas import tpu as pltpu

PAD_IDX = 0
MASK_IDX = 1

_INV_SQRT2 = 1.0 / math.sqrt(2.0)
_NEG_BIG = -1e30  # plain Python float: never captured as a jnp constant
_LN_EPS = 1e-5


def _default_vmem_limit():
    # 96 MiB on 128-MiB parts (v5e/v6e), conservative 48 MiB otherwise (v7x /
    # unknown / interpret).
    try:
        info = pltpu.get_tpu_info()
        cap = getattr(info, "vmem_capacity_bytes", None)
        if cap is not None and cap >= 128 * 1024 * 1024:
            return 96 * 1024 * 1024
    except Exception:
        pass
    return 48 * 1024 * 1024


VMEM_LIMIT_BYTES = _default_vmem_limit()


def _compiler_params(semantics):
    return pltpu.CompilerParams(dimension_semantics=semantics,
                                vmem_limit_bytes=VMEM_LIMIT_BYTES)


def _pick_tile(dim, target, quantum):
    """Largest multiple of `quantum` <= target that divides dim, else full dim."""
    if dim <= target:
        return dim
    t = (target // quantum) * quantum
    while t >= quantum:
        if dim % t == 0:
            return t
        t -= quantum
    return dim


def _gelu_exact(y):
    # exact (erf) GELU, matching PyTorch activation='gelu'
    return 0.5 * y * (1.0 + jax.lax.erf(y * _INV_SQRT2))


def _ln_body(x, g, b, eps):
    mu = jnp.mean(x, axis=-1, keepdims=True)
    xc = x - mu
    var = jnp.mean(xc * xc, axis=-1, keepdims=True)
    return xc * jax.lax.rsqrt(var + eps) * g + b


# ----------------------------------------------------------------------------
# Tiled linear: y = x @ w + b   (x: (M,K) f32, w: (K,N) bf16 [in,out], b: (N,))
# ----------------------------------------------------------------------------
def _linear_kernel(x_ref, w_ref, b_ref, o_ref, acc_ref):
    @pl.when(pl.program_id(2) == 0)
    def _init():
        acc_ref[...] = jnp.zeros_like(acc_ref)

    acc_ref[...] += jnp.dot(x_ref[...].astype(jnp.bfloat16), w_ref[...],
                            preferred_element_type=jnp.float32)

    @pl.when(pl.program_id(2) == pl.num_programs(2) - 1)
    def _finalize():
        o_ref[...] = (acc_ref[...] + b_ref[...]).astype(o_ref.dtype)


def linear(x, w, b, *, tm=256, tn=256, tk=512):
    M, K = x.shape
    N = w.shape[1]
    tm = _pick_tile(M, tm, 8)
    tn = _pick_tile(N, tn, 128)
    tk = _pick_tile(K, tk, 128)
    grid = (M // tm, N // tn, K // tk)
    return pl.pallas_call(
        _linear_kernel,
        out_shape=jax.ShapeDtypeStruct((M, N), jnp.float32),
        grid=grid,
        in_specs=[
            pl.BlockSpec((tm, tk), lambda i, j, k: (i, k)),
            pl.BlockSpec((tk, tn), lambda i, j, k: (k, j)),
            pl.BlockSpec((1, tn), lambda i, j, k: (0, j)),
        ],
        out_specs=pl.BlockSpec((tm, tn), lambda i, j, k: (i, j)),
        scratch_shapes=[pltpu.VMEM((tm, tn), jnp.float32)],
        compiler_params=_compiler_params(("parallel", "parallel", "arbitrary")),
    )(x, w, b.reshape(1, N))


# ----------------------------------------------------------------------------
# Fused FFN block:  out = LN( x + (GELU(x @ w1 + b1) @ w2 + b2) )
# K-tiled over the feed-forward dim; intermediate stays in VMEM.
# ----------------------------------------------------------------------------
def _ffn_ln_kernel(x_ref, w1_ref, b1_ref, w2_ref, b2_ref, res_ref, g_ref, be_ref,
                   o_ref, acc_ref, *, eps):
    kf = pl.program_id(1)

    @pl.when(kf == 0)
    def _init():
        acc_ref[...] = jnp.zeros_like(acc_ref)

    h = jnp.dot(x_ref[...].astype(jnp.bfloat16), w1_ref[...],
                preferred_element_type=jnp.float32) + b1_ref[...]
    h = _gelu_exact(h)
    acc_ref[...] += jnp.dot(h.astype(jnp.bfloat16), w2_ref[...],
                            preferred_element_type=jnp.float32)

    @pl.when(kf == pl.num_programs(1) - 1)
    def _finalize():
        y = acc_ref[...] + b2_ref[...] + res_ref[...]
        o_ref[...] = _ln_body(y, g_ref[...], be_ref[...], eps).astype(o_ref.dtype)


def ffn_ln_block(x2d, w1, b1, w2, b2, gamma, beta, eps=_LN_EPS):
    M, E = x2d.shape
    FF = w1.shape[1]
    tm = _pick_tile(M, 512, 8)
    tf = _pick_tile(FF, 2048, 128)
    grid = (M // tm, FF // tf)
    return pl.pallas_call(
        functools.partial(_ffn_ln_kernel, eps=eps),
        out_shape=jax.ShapeDtypeStruct((M, E), jnp.float32),
        grid=grid,
        in_specs=[
            pl.BlockSpec((tm, E), lambda i, kf: (i, 0)),
            pl.BlockSpec((E, tf), lambda i, kf: (0, kf)),
            pl.BlockSpec((1, tf), lambda i, kf: (0, kf)),
            pl.BlockSpec((tf, E), lambda i, kf: (kf, 0)),
            pl.BlockSpec((1, E), lambda i, kf: (0, 0)),
            pl.BlockSpec((tm, E), lambda i, kf: (i, 0)),
            pl.BlockSpec((1, E), lambda i, kf: (0, 0)),
            pl.BlockSpec((1, E), lambda i, kf: (0, 0)),
        ],
        out_specs=pl.BlockSpec((tm, E), lambda i, kf: (i, 0)),
        scratch_shapes=[pltpu.VMEM((tm, E), jnp.float32)],
        compiler_params=_compiler_params(("parallel", "arbitrary")),
    )(x2d, w1, b1.reshape(1, FF), w2, b2.reshape(1, E), x2d,
      gamma.reshape(1, E), beta.reshape(1, E))


# ----------------------------------------------------------------------------
# Plain LayerNorm (final decoder norm), row-tiled
# ----------------------------------------------------------------------------
def _ln_kernel(x_ref, g_ref, b_ref, o_ref, *, eps):
    o_ref[...] = _ln_body(x_ref[...], g_ref[...], b_ref[...], eps).astype(o_ref.dtype)


def layernorm(x2d, gamma, beta, eps=_LN_EPS):
    M, E = x2d.shape
    tr = _pick_tile(M, 1024, 8)
    return pl.pallas_call(
        functools.partial(_ln_kernel, eps=eps),
        out_shape=jax.ShapeDtypeStruct((M, E), jnp.float32),
        grid=(M // tr,),
        in_specs=[pl.BlockSpec((tr, E), lambda i: (i, 0)),
                  pl.BlockSpec((1, E), lambda i: (0, 0)),
                  pl.BlockSpec((1, E), lambda i: (0, 0))],
        out_specs=pl.BlockSpec((tr, E), lambda i: (i, 0)),
        compiler_params=_compiler_params(("parallel",)),
    )(x2d, gamma.reshape(1, E), beta.reshape(1, E))


# ----------------------------------------------------------------------------
# Attention blocks: per-batch, all heads per grid step, fused output
# projection (full-E contraction) + residual-add + LayerNorm epilogue.
# ----------------------------------------------------------------------------
def _attn_ln_core(q_all, k_all, v_all, bias, res, wo, bo, g, b,
                  *, scale, causal, nhead, eps):
    Sq = q_all.shape[0]
    Sk = k_all.shape[0]
    Dh = q_all.shape[1] // nhead
    if causal:
        qi = jax.lax.broadcasted_iota(jnp.int32, (Sq, Sk), 0)
        kj = jax.lax.broadcasted_iota(jnp.int32, (Sq, Sk), 1)
        add_mask = jnp.where(kj <= qi, bias, _NEG_BIG)      # (Sq, Sk), built once
    else:
        add_mask = bias                                       # (1, Sk), broadcasts

    qb = q_all.astype(jnp.bfloat16)
    kb = k_all.astype(jnp.bfloat16)
    vb = v_all.astype(jnp.bfloat16)

    ctxs = []
    for h in range(nhead):
        sl = slice(h * Dh, (h + 1) * Dh)
        s = jnp.dot(qb[:, sl], kb[:, sl].T, preferred_element_type=jnp.float32)
        s = s * scale + add_mask
        m = jnp.max(s, axis=-1, keepdims=True)
        p = jnp.exp(s - m)
        l = jnp.sum(p, axis=-1, keepdims=True)
        c = jnp.dot(p.astype(jnp.bfloat16), vb[:, sl],
                    preferred_element_type=jnp.float32)
        ctxs.append(c / l)                                    # exact normalization

    ctx = jnp.concatenate(ctxs, axis=-1)                      # (Sq, E) f32
    attn = jnp.dot(ctx.astype(jnp.bfloat16), wo,
                   preferred_element_type=jnp.float32) + bo   # full-E contraction
    return _ln_body(attn + res, g, b, eps)


def _self_attn_ln_kernel(qkv_ref, res_ref, bias_ref, wo_ref, bo_ref, g_ref, b_ref,
                         o_ref, *, scale, nhead, eps):
    qkv = qkv_ref[0]                       # (S, 3E)
    E = res_ref.shape[-1]
    out = _attn_ln_core(qkv[:, :E], qkv[:, E:2 * E], qkv[:, 2 * E:],
                        bias_ref[0], res_ref[0], wo_ref[...], bo_ref[...],
                        g_ref[...], b_ref[...],
                        scale=scale, causal=True, nhead=nhead, eps=eps)
    o_ref[...] = out[None].astype(o_ref.dtype)


def _cross_attn_ln_kernel(q_ref, kv_ref, res_ref, bias_ref, wo_ref, bo_ref, g_ref,
                          b_ref, o_ref, *, scale, nhead, eps):
    kv = kv_ref[0]                         # (Sk, 2E)
    E = q_ref.shape[-1]
    out = _attn_ln_core(q_ref[0], kv[:, :E], kv[:, E:],
                        bias_ref[0], res_ref[0], wo_ref[...], bo_ref[...],
                        g_ref[...], b_ref[...],
                        scale=scale, causal=False, nhead=nhead, eps=eps)
    o_ref[...] = out[None].astype(o_ref.dtype)


def self_attn_ln_block(qkv3d, x, bias, wo, bo, gamma, beta, nhead, eps=_LN_EPS):
    """qkv3d: (B,S,3E) fused projection output, x: (B,S,E) residual,
    bias: (B,1,S) additive key-padding bias. Returns LN(x + SelfAttn(...))."""
    B, S, E = x.shape
    Dh = E // nhead
    return pl.pallas_call(
        functools.partial(_self_attn_ln_kernel, scale=1.0 / math.sqrt(Dh),
                          nhead=nhead, eps=eps),
        out_shape=jax.ShapeDtypeStruct((B, S, E), jnp.float32),
        grid=(B,),
        in_specs=[
            pl.BlockSpec((1, S, 3 * E), lambda b: (b, 0, 0)),
            pl.BlockSpec((1, S, E), lambda b: (b, 0, 0)),
            pl.BlockSpec((1, 1, S), lambda b: (b, 0, 0)),
            pl.BlockSpec((E, E), lambda b: (0, 0)),
            pl.BlockSpec((1, E), lambda b: (0, 0)),
            pl.BlockSpec((1, E), lambda b: (0, 0)),
            pl.BlockSpec((1, E), lambda b: (0, 0)),
        ],
        out_specs=pl.BlockSpec((1, S, E), lambda b: (b, 0, 0)),
        compiler_params=_compiler_params(("parallel",)),
    )(qkv3d, x, bias, wo, bo.reshape(1, E), gamma.reshape(1, E), beta.reshape(1, E))


def cross_attn_ln_block(q3d, kv3d, x, bias, wo, bo, gamma, beta, nhead, eps=_LN_EPS):
    """q3d: (B,Sq,E), kv3d: (B,Sk,2E), x: (B,Sq,E) residual, bias: (B,1,Sk)."""
    B, Sq, E = x.shape
    Sk = kv3d.shape[1]
    Dh = E // nhead
    return pl.pallas_call(
        functools.partial(_cross_attn_ln_kernel, scale=1.0 / math.sqrt(Dh),
                          nhead=nhead, eps=eps),
        out_shape=jax.ShapeDtypeStruct((B, Sq, E), jnp.float32),
        grid=(B,),
        in_specs=[
            pl.BlockSpec((1, Sq, E), lambda b: (b, 0, 0)),
            pl.BlockSpec((1, Sk, 2 * E), lambda b: (b, 0, 0)),
            pl.BlockSpec((1, Sq, E), lambda b: (b, 0, 0)),
            pl.BlockSpec((1, 1, Sk), lambda b: (b, 0, 0)),
            pl.BlockSpec((E, E), lambda b: (0, 0)),
            pl.BlockSpec((1, E), lambda b: (0, 0)),
            pl.BlockSpec((1, E), lambda b: (0, 0)),
            pl.BlockSpec((1, E), lambda b: (0, 0)),
        ],
        out_specs=pl.BlockSpec((1, Sq, E), lambda b: (b, 0, 0)),
        compiler_params=_compiler_params(("parallel",)),
    )(q3d, kv3d, x, bias, wo, bo.reshape(1, E), gamma.reshape(1, E), beta.reshape(1, E))


# ----------------------------------------------------------------------------
# Transformer decoder glue (post-norm, eval mode)
# ----------------------------------------------------------------------------
def decoder_layer(x, memory, lp, nhead, dec_bias, mem_bias):
    B, S, E = x.shape
    Sk = memory.shape[1]

    # self-attention block: x = LN1(x + SelfAttn(x))
    qkv = linear(x.reshape(B * S, E), lp["self"]["in_w"],
                 lp["self"]["in_b"]).reshape(B, S, 3 * E)
    x = self_attn_ln_block(qkv, x, dec_bias, lp["self"]["out_w"],
                           lp["self"]["out_b"], lp["ln1_g"], lp["ln1_b"], nhead)

    # cross-attention block: x = LN2(x + CrossAttn(x, memory))
    q = linear(x.reshape(B * S, E), lp["cross"]["q_w"],
               lp["cross"]["q_b"]).reshape(B, S, E)
    kv = linear(memory.reshape(B * Sk, E), lp["cross"]["kv_w"],
                lp["cross"]["kv_b"]).reshape(B, Sk, 2 * E)
    x = cross_attn_ln_block(q, kv, x, mem_bias, lp["cross"]["out_w"],
                            lp["cross"]["out_b"], lp["ln2_g"], lp["ln2_b"], nhead)

    # FFN block: x = LN3(x + FFN(x))
    x = ffn_ln_block(x.reshape(B * S, E), lp["ff1_w"], lp["ff1_b"],
                     lp["ff2_w"], lp["ff2_b"], lp["ln3_g"], lp["ln3_b"]
                     ).reshape(B, S, E)
    return x


def positional_encoding(seq_len, embed_dim, max_len=1024):
    position = jnp.arange(max_len, dtype=jnp.float32)[:, None]
    div_term = jnp.exp(jnp.arange(0, embed_dim, 2, dtype=jnp.float32)
                       * (-math.log(10000.0) / embed_dim))
    pe = jnp.zeros((max_len, embed_dim), jnp.float32)
    pe = pe.at[:, 0::2].set(jnp.sin(position * div_term))
    pe = pe.at[:, 1::2].set(jnp.cos(position * div_term))
    return pe[:seq_len]


def decoder_forward(params, inp, dec_out, memory, nhead, shift=True):
    # TODO(synk): the PyTorch module calls self.encoder(inp, repr=True, ...) when
    # `repr is None`; here the encoder output (`memory`) is supplied directly.
    if shift:
        dec_in = jnp.concatenate(
            [jnp.full_like(dec_out[:, :1], MASK_IDX), dec_out[:, :-1]], axis=1)
    else:
        dec_in = dec_out
    enc_pad = (inp == PAD_IDX)
    dec_pad = (dec_in == PAD_IDX)

    B, S = dec_in.shape
    V, E = params["embed"].shape

    x = params["embed"][dec_in] * math.sqrt(E)          # embedding * sqrt(d_model)
    x = x + positional_encoding(S, E)[None, :, :]       # positional encoding
    x = jnp.where(dec_pad[:, :, None], 0.0, x)          # x[pad_mask] = 0
    # dropout: eval-mode identity

    # tiny additive key-padding biases (no per-head replication, no (S,S) mask DMA)
    dec_bias = jnp.where(dec_pad, _NEG_BIG, 0.0).astype(jnp.float32)[:, None, :]
    mem_bias = jnp.where(enc_pad, _NEG_BIG, 0.0).astype(jnp.float32)[:, None, :]

    for lp in params["layers"]:
        x = decoder_layer(x, memory, lp, nhead, dec_bias, mem_bias)

    x = layernorm(x.reshape(B * S, E), params["norm_g"], params["norm_b"])
    logits = linear(x, params["fc_w"], params["fc_b"]).reshape(B, S, V)
    return logits


# ----------------------------------------------------------------------------
# Deterministic parameter init. Matmul weights stored pre-transposed [in, out]
# and in bf16 (halved DMA bytes); biases / LN params / embedding stay f32.
# ----------------------------------------------------------------------------
def init_params(key, num_tokens, embed_dim, nhead, ff, layers):
    keys = iter(jax.random.split(key, 128))

    def wgt(shape, s=0.02):
        return (s * jax.random.normal(next(keys), shape,
                                      dtype=jnp.float32)).astype(jnp.bfloat16)

    def bias(shape, s=0.02):
        return s * jax.random.normal(next(keys), shape, dtype=jnp.float32)

    emb = 0.02 * jax.random.normal(next(keys), (num_tokens, embed_dim),
                                   dtype=jnp.float32)
    emb = emb.at[PAD_IDX].set(0.0)                      # padding_idx row is zero
    p = {"embed": emb, "layers": []}
    for _ in range(layers):
        lp = {}
        lp["self"] = dict(
            in_w=wgt((embed_dim, 3 * embed_dim)),       # fused QKV, [in, out]
            in_b=bias((3 * embed_dim,)),
            out_w=wgt((embed_dim, embed_dim)),
            out_b=bias((embed_dim,)),
        )
        lp["cross"] = dict(
            q_w=wgt((embed_dim, embed_dim)),
            q_b=bias((embed_dim,)),
            kv_w=wgt((embed_dim, 2 * embed_dim)),       # fused KV, [in, out]
            kv_b=bias((2 * embed_dim,)),
            out_w=wgt((embed_dim, embed_dim)),
            out_b=bias((embed_dim,)),
        )
        lp["ff1_w"] = wgt((embed_dim, ff))
        lp["ff1_b"] = bias((ff,))
        lp["ff2_w"] = wgt((ff, embed_dim))
        lp["ff2_b"] = bias((embed_dim,))
        for i in (1, 2, 3):
            lp[f"ln{i}_g"] = jnp.ones((embed_dim,), jnp.float32)
            lp[f"ln{i}_b"] = jnp.zeros((embed_dim,), jnp.float32)
        p["layers"].append(lp)
    p["norm_g"] = jnp.ones((embed_dim,), jnp.float32)
    p["norm_b"] = jnp.zeros((embed_dim,), jnp.float32)
    p["fc_w"] = wgt((embed_dim, num_tokens))
    p["fc_b"] = bias((num_tokens,))
    return p


if __name__ == "__main__":
    B, S_DEC, S_MEM = 2, 8, 8
    EMBED, NHEAD, FF, LAYERS, NUM_TOKENS = 32, 4, 64, 2, 16

    key = jax.random.PRNGKey(0)
    k_param, k_inp, k_dec, k_mem = jax.random.split(key, 4)

    params = init_params(k_param, NUM_TOKENS, EMBED, NHEAD, FF, LAYERS)

    # token ids drawn from [2, NUM_TOKENS) so no PAD tokens (keeps softmax rows live)
    inp = jax.random.randint(k_inp, (B, S_MEM), 2, NUM_TOKENS, dtype=jnp.int32)
    dec_out = jax.random.randint(k_dec, (B, S_DEC), 2, NUM_TOKENS, dtype=jnp.int32)
    memory = 0.1 * jax.random.normal(k_mem, (B, S_MEM, EMBED), dtype=jnp.float32)

    fwd = jax.jit(functools.partial(decoder_forward, nhead=NHEAD))
    logits = fwd(params, inp, dec_out, memory)
    jax.block_until_ready(logits)

    assert logits.shape == (B, S_DEC, NUM_TOKENS), logits.shape
    assert bool(jnp.all(jnp.isfinite(logits)))
    print("KERNEL_OK")
</pallas_src>

<mosaic_0001>
module attributes {stable_mosaic.version = 11 : i64} {
  func.func @_linear_kernel(%arg0: i32, %arg1: i32, %arg2: i32, %arg3: memref<16x32xf32, #tpu.memory_space<vmem>>, %arg4: memref<32x96xbf16, #tpu.memory_space<vmem>>, %arg5: memref<1x96xf32, #tpu.memory_space<vmem>>, %arg6: memref<16x96xf32, #tpu.memory_space<vmem>>, %arg7: memref<16x96xf32, #tpu.memory_space<vmem>>) attributes {dimension_semantics = [#tpu.dimension_semantics<parallel>, #tpu.dimension_semantics<parallel>, #tpu.dimension_semantics<arbitrary>], iteration_bounds = array<i64: 1, 1, 1>, scalar_prefetch = 0 : i64, scratch_operands = 1 : i64, tpu.core_type = #tpu.core_type<tc>, window_params = [{transform_indices = @transform_0, window_bounds = array<i64: 16, 32>}, {transform_indices = @transform_1, window_bounds = array<i64: 32, 96>}, {transform_indices = @transform_2, window_bounds = array<i64: 1, 96>}, {transform_indices = @transform_3, window_bounds = array<i64: 16, 96>}]} {
    %c0_i32 = arith.constant 0 : i32
    %0 = arith.cmpi eq, %arg2, %c0_i32 : i32
    %1 = arith.extui %0 : i1 to i32
    %c0_i32_0 = arith.constant 0 : i32
    %2 = arith.cmpi ne, %1, %c0_i32_0 : i32
    scf.if %2 {
      %cst_10 = arith.constant 0.000000e+00 : f32
      %13 = vector.broadcast %cst_10 : f32 to vector<16x96xf32>
      %c0_11 = arith.constant 0 : index
      %c0_12 = arith.constant 0 : index
      %14 = vector.load %arg7[%c0_11, %c0_12] : memref<16x96xf32, #tpu.memory_space<vmem>>, vector<16x96xf32>
      tpu.vector_store %arg7[%c0_11, %c0_12], %13 {strides = array<i32>} : memref<16x96xf32, #tpu.memory_space<vmem>>, vector<16x96xf32>,
    } else {
    }
    %c0 = arith.constant 0 : index
    %c0_1 = arith.constant 0 : index
    %3 = vector.load %arg7[%c0, %c0_1] : memref<16x96xf32, #tpu.memory_space<vmem>>, vector<16x96xf32>
    %c0_2 = arith.constant 0 : index
    %c0_3 = arith.constant 0 : index
    %4 = vector.load %arg3[%c0_2, %c0_3] : memref<16x32xf32, #tpu.memory_space<vmem>>, vector<16x32xf32>
    %5 = arith.truncf %4 : vector<16x32xf32> to vector<16x32xbf16>
    %c0_4 = arith.constant 0 : index
    %c0_5 = arith.constant 0 : index
    %6 = vector.load %arg4[%c0_4, %c0_5] : memref<32x96xbf16, #tpu.memory_space<vmem>>, vector<32x96xbf16>
    %cst = arith.constant dense<0.000000e+00> : vector<16x96xf32>
    %7 = tpu.matmul %5, %6, %cst {dimension_numbers = #tpu.dot_dimension_numbers<[1], [0], [0], [1], [0, 0, 1, 1], [], []>} : vector<16x32xbf16>, vector<32x96xbf16>, vector<16x96xf32> -> vector<16x96xf32>
    %8 = arith.addf %3, %7 : vector<16x96xf32>
    %c0_6 = arith.constant 0 : index
    %c0_7 = arith.constant 0 : index
    %9 = vector.load %arg7[%c0_6, %c0_7] : memref<16x96xf32, #tpu.memory_space<vmem>>, vector<16x96xf32>
    tpu.vector_store %arg7[%c0_6, %c0_7], %8 {strides = array<i32>} : memref<16x96xf32, #tpu.memory_space<vmem>>, vector<16x96xf32>,
    %c0_i32_8 = arith.constant 0 : i32
    %10 = arith.cmpi eq, %arg2, %c0_i32_8 : i32
    %11 = arith.extui %10 : i1 to i32
    %c0_i32_9 = arith.constant 0 : i32
    %12 = arith.cmpi ne, %11, %c0_i32_9 : i32
    scf.if %12 {
      %c0_10 = arith.constant 0 : index
      %c0_11 = arith.constant 0 : index
      %13 = vector.load %arg7[%c0_10, %c0_11] : memref<16x96xf32, #tpu.memory_space<vmem>>, vector<16x96xf32>
      %c0_12 = arith.constant 0 : index
      %c0_13 = arith.constant 0 : index
      %14 = vector.load %arg5[%c0_12, %c0_13] : memref<1x96xf32, #tpu.memory_space<vmem>>, vector<1x96xf32>
      %15 = vector.broadcast %14 : vector<1x96xf32> to vector<16x96xf32>
      %16 = arith.addf %13, %15 : vector<16x96xf32>
      %c0_14 = arith.constant 0 : index
      %c0_15 = arith.constant 0 : index
      %17 = vector.load %arg6[%c0_14, %c0_15] : memref<16x96xf32, #tpu.memory_space<vmem>>, vector<16x96xf32>
      tpu.vector_store %arg6[%c0_14, %c0_15], %16 {strides = array<i32>} : memref<16x96xf32, #tpu.memory_space<vmem>>, vector<16x96xf32>,
    } else {
    }
    return
  }
  func.func @transform_0(%arg0: i32, %arg1: i32, %arg2: i32) -> (i32, i32) {
    %c0_i32 = arith.constant 0 : i32
    return %arg0, %arg2 : i32, i32
  }
  func.func @transform_1(%arg0: i32, %arg1: i32, %arg2: i32) -> (i32, i32) {
    %c0_i32 = arith.constant 0 : i32
    return %arg2, %arg1 : i32, i32
  }
  func.func @transform_2(%arg0: i32, %arg1: i32, %arg2: i32) -> (i32, i32) {
    %c0_i32 = arith.constant 0 : i32
    %c0_i32_0 = arith.constant 0 : i32
    return %c0_i32, %arg1 : i32, i32
  }
  func.func @transform_3(%arg0: i32, %arg1: i32, %arg2: i32) -> (i32, i32) {
    %c0_i32 = arith.constant 0 : i32
    return %arg0, %arg1 : i32, i32
  }
}

module attributes {stable_mosaic.version = 11 : i64} {
  func.func @_self_attn_ln_kernel(%arg0: i32, %arg1: memref<1x8x96xf32, #tpu.memory_space<vmem>>, %arg2: memref<1x8x32xf32, #tpu.memory_space<vmem>>, %arg3: memref<1x1x8xf32, #tpu.memory_space<vmem>>, %arg4: memref<32x32xbf16, #tpu.memory_space<vmem>>, %arg5: memref<1x32xf32, #tpu.memory_space<vmem>>, %arg6: memref<1x32xf32, #tpu.memory_space<vmem>>, %arg7: memref<1x32xf32, #tpu.memory_space<vmem>>, %arg8: memref<1x8x32xf32, #tpu.memory_space<vmem>>) attributes {dimension_semantics = [#tpu.dimension_semantics<parallel>], iteration_bounds = array<i64: 2>, scalar_prefetch = 0 : i64, scratch_operands = 0 : i64, tpu.core_type = #tpu.core_type<tc>, window_params = [{transform_indices = @transform_0, window_bounds = array<i64: 1, 8, 96>}, {transform_indices = @transform_1, window_bounds = array<i64: 1, 8, 32>}, {transform_indices = @transform_2, window_bounds = array<i64: 1, 1, 8>}, {pipeline_mode = #tpu.pipeline_mode<synchronous>, transform_indices = @transform_3, window_bounds = array<i64: 32, 32>}, {pipeline_mode = #tpu.pipeline_mode<synchronous>, transform_indices = @transform_4, window_bounds = array<i64: 1, 32>}, {pipeline_mode = #tpu.pipeline_mode<synchronous>, transform_indices = @transform_5, window_bounds = array<i64: 1, 32>}, {pipeline_mode = #tpu.pipeline_mode<synchronous>, transform_indices = @transform_6, window_bounds = array<i64: 1, 32>}, {transform_indices = @transform_7, window_bounds = array<i64: 1, 8, 32>}]} {
    %c0 = arith.constant 0 : index
    %c0_0 = arith.constant 0 : index
    %c0_1 = arith.constant 0 : index
    %0 = vector.load %arg1[%c0, %c0_0, %c0_1] : memref<1x8x96xf32, #tpu.memory_space<vmem>>, vector<1x8x96xf32>
    %1 = vector.shape_cast %0 : vector<1x8x96xf32> to vector<8x96xf32>
    %2 = vector.extract_strided_slice %1 {offsets = [0, 0], sizes = [8, 32], strides = [1, 1]} : vector<8x96xf32> to vector<8x32xf32>
    %3 = vector.extract_strided_slice %1 {offsets = [0, 32], sizes = [8, 32], strides = [1, 1]} : vector<8x96xf32> to vector<8x32xf32>
    %4 = vector.extract_strided_slice %1 {offsets = [0, 64], sizes = [8, 32], strides = [1, 1]} : vector<8x96xf32> to vector<8x32xf32>
    %c0_2 = arith.constant 0 : index
    %c0_3 = arith.constant 0 : index
    %c0_4 = arith.constant 0 : index
    %5 = vector.load %arg3[%c0_2, %c0_3, %c0_4] : memref<1x1x8xf32, #tpu.memory_space<vmem>>, vector<1x1x8xf32>
    %6 = vector.shape_cast %5 : vector<1x1x8xf32> to vector<1x8xf32>
    %c0_5 = arith.constant 0 : index
    %c0_6 = arith.constant 0 : index
    %c0_7 = arith.constant 0 : index
    %7 = vector.load %arg2[%c0_5, %c0_6, %c0_7] : memref<1x8x32xf32, #tpu.memory_space<vmem>>, vector<1x8x32xf32>
    %8 = vector.shape_cast %7 : vector<1x8x32xf32> to vector<8x32xf32>
    %c0_8 = arith.constant 0 : index
    %c0_9 = arith.constant 0 : index
    %9 = vector.load %arg4[%c0_8, %c0_9] : memref<32x32xbf16, #tpu.memory_space<vmem>>, vector<32x32xbf16>
    %c0_10 = arith.constant 0 : index
    %c0_11 = arith.constant 0 : index
    %10 = vector.load %arg5[%c0_10, %c0_11] : memref<1x32xf32, #tpu.memory_space<vmem>>, vector<1x32xf32>
    %c0_12 = arith.constant 0 : index
    %c0_13 = arith.constant 0 : index
    %11 = vector.load %arg6[%c0_12, %c0_13] : memref<1x32xf32, #tpu.memory_space<vmem>>, vector<1x32xf32>
    %c0_14 = arith.constant 0 : index
    %c0_15 = arith.constant 0 : index
    %12 = vector.load %arg7[%c0_14, %c0_15] : memref<1x32xf32, #tpu.memory_space<vmem>>, vector<1x32xf32>
    %13 = tpu.iota {dimensions = array<i32: 0>} : vector<8x8xi32>
    %14 = tpu.iota {dimensions = array<i32: 1>} : vector<8x8xi32>
    %15 = arith.cmpi sle, %14, %13 : vector<8x8xi32>
    %cst = arith.constant -1.000000e+30 : f32
    %16 = vector.shape_cast %6 : vector<1x8xf32> to vector<1x8xf32>
    %17 = vector.broadcast %16 : vector<1x8xf32> to vector<8x8xf32>
    %18 = vector.broadcast %cst : f32 to vector<8x8xf32>
    %19 = arith.select %15, %17, %18 : vector<8x8xi1>, vector<8x8xf32>
    %20 = arith.truncf %2 : vector<8x32xf32> to vector<8x32xbf16>
    %21 = arith.truncf %3 : vector<8x32xf32> to vector<8x32xbf16>
    %22 = arith.truncf %4 : vector<8x32xf32> to vector<8x32xbf16>
    %23 = vector.extract_strided_slice %20 {offsets = [0, 0], sizes = [8, 8], strides = [1, 1]} : vector<8x32xbf16> to vector<8x8xbf16>
    %24 = vector.extract_strided_slice %21 {offsets = [0, 0], sizes = [8, 8], strides = [1, 1]} : vector<8x32xbf16> to vector<8x8xbf16>
    %25 = tpu.transpose %24, [1, 0] : vector<8x8xbf16> -> vector<8x8xbf16>
    %cst_16 = arith.constant dense<0.000000e+00> : vector<8x8xf32>
    %26 = tpu.matmul %23, %25, %cst_16 {dimension_numbers = #tpu.dot_dimension_numbers<[1], [0], [0], [1], [0, 0, 1, 1], [], []>} : vector<8x8xbf16>, vector<8x8xbf16>, vector<8x8xf32> -> vector<8x8xf32>
    %cst_17 = arith.constant 0.353553385 : f32
    %27 = vector.broadcast %cst_17 : f32 to vector<8x8xf32>
    %28 = arith.mulf %26, %27 : vector<8x8xf32>
    %29 = arith.addf %28, %19 : vector<8x8xf32>
    %cst_18 = arith.constant dense<0xFF800000> : vector<8xf32>
    %30 = vector.multi_reduction <maximumf>, %29, %cst_18 [1] : vector<8x8xf32> to vector<8xf32>
    %31 = vector.shape_cast %30 : vector<8xf32> to vector<8x1xf32>
    %32 = vector.broadcast %31 : vector<8x1xf32> to vector<8x8xf32>
    %33 = arith.subf %29, %32 : vector<8x8xf32>
    %34 = math.exp %33 : vector<8x8xf32>
    %cst_19 = arith.constant dense<0.000000e+00> : vector<8xf32>
    %35 = vector.multi_reduction <add>, %34, %cst_19 [1] : vector<8x8xf32> to vector<8xf32>
    %36 = vector.shape_cast %35 : vector<8xf32> to vector<8x1xf32>
    %37 = arith.truncf %34 : vector<8x8xf32> to vector<8x8xbf16>
    %38 = vector.extract_strided_slice %22 {offsets = [0, 0], sizes = [8, 8], strides = [1, 1]} : vector<8x32xbf16> to vector<8x8xbf16>
    %cst_20 = arith.constant dense<0.000000e+00> : vector<8x8xf32>
    %39 = tpu.matmul %37, %38, %cst_20 {dimension_numbers = #tpu.dot_dimension_numbers<[1], [0], [0], [1], [0, 0, 1, 1], [], []>} : vector<8x8xbf16>, vector<8x8xbf16>, vector<8x8xf32> -> vector<8x8xf32>
    %40 = vector.broadcast %36 : vector<8x1xf32> to vector<8x8xf32>
    %41 = arith.divf %39, %40 : vector<8x8xf32>
    %42 = vector.extract_strided_slice %20 {offsets = [0, 8], sizes = [8, 8], strides = [1, 1]} : vector<8x32xbf16> to vector<8x8xbf16>
    %43 = vector.extract_strided_slice %21 {offsets = [0, 8], sizes = [8, 8], strides = [1, 1]} : vector<8x32xbf16> to vector<8x8xbf16>
    %44 = tpu.transpose %43, [1, 0] : vector<8x8xbf16> -> vector<8x8xbf16>
    %cst_21 = arith.constant dense<0.000000e+00> : vector<8x8xf32>
    %45 = tpu.matmul %42, %44, %cst_21 {dimension_numbers = #tpu.dot_dimension_numbers<[1], [0], [0], [1], [0, 0, 1, 1], [], []>} : vector<8x8xbf16>, vector<8x8xbf16>, vector<8x8xf32> -> vector<8x8xf32>
    %cst_22 = arith.constant 0.353553385 : f32
    %46 = vector.broadcast %cst_22 : f32 to vector<8x8xf32>
    %47 = arith.mulf %45, %46 : vector<8x8xf32>
    %48 = arith.addf %47, %19 : vector<8x8xf32>
    %cst_23 = arith.constant dense<0xFF800000> : vector<8xf32>
    %49 = vector.multi_reduction <maximumf>, %48, %cst_23 [1] : vector<8x8xf32> to vector<8xf32>
    %50 = vector.shape_cast %49 : vector<8xf32> to vector<8x1xf32>
    %51 = vector.broadcast %50 : vector<8x1xf32> to vector<8x8xf32>
    %52 = arith.subf %48, %51 : vector<8x8xf32>
    %53 = math.exp %52 : vector<8x8xf32>
    %cst_24 = arith.constant dense<0.000000e+00> : vector<8xf32>
    %54 = vector.multi_reduction <add>, %53, %cst_24 [1] : vector<8x8xf32> to vector<8xf32>
    %55 = vector.shape_cast %54 : vector<8xf32> to vector<8x1xf32>
    %56 = arith.truncf %53 : vector<8x8xf32> to vector<8x8xbf16>
    %57 = vector.extract_strided_slice %22 {offsets = [0, 8], sizes = [8, 8], strides = [1, 1]} : vector<8x32xbf16> to vector<8x8xbf16>
    %cst_25 = arith.constant dense<0.000000e+00> : vector<8x8xf32>
    %58 = tpu.matmul %56, %57, %cst_25 {dimension_numbers = #tpu.dot_dimension_numbers<[1], [0], [0], [1], [0, 0, 1, 1], [], []>} : vector<8x8xbf16>, vector<8x8xbf16>, vector<8x8xf32> -> vector<8x8xf32>
    %59 = vector.broadcast %55 : vector<8x1xf32> to vector<8x8xf32>
    %60 = arith.divf %58, %59 : vector<8x8xf32>
    %61 = vector.extract_strided_slice %20 {offsets = [0, 16], sizes = [8, 8], strides = [1, 1]} : vector<8x32xbf16> to vector<8x8xbf16>
    %62 = vector.extract_strided_slice %21 {offsets = [0, 16], sizes = [8, 8], strides = [1, 1]} : vector<8x32xbf16> to vector<8x8xbf16>
    %63 = tpu.transpose %62, [1, 0] : vector<8x8xbf16> -> vector<8x8xbf16>
    %cst_26 = arith.constant dense<0.000000e+00> : vector<8x8xf32>
    %64 = tpu.matmul %61, %63, %cst_26 {dimension_numbers = #tpu.dot_dimension_numbers<[1], [0], [0], [1], [0, 0, 1, 1], [], []>} : vector<8x8xbf16>, vector<8x8xbf16>, vector<8x8xf32> -> vector<8x8xf32>
    %cst_27 = arith.constant 0.353553385 : f32
    %65 = vector.broadcast %cst_27 : f32 to vector<8x8xf32>
    %66 = arith.mulf %64, %65 : vector<8x8xf32>
    %67 = arith.addf %66, %19 : vector<8x8xf32>
    %cst_28 = arith.constant dense<0xFF800000> : vector<8xf32>
    %68 = vector.multi_reduction <maximumf>, %67, %cst_28 [1] : vector<8x8xf32> to vector<8xf32>
    %69 = vector.shape_cast %68 : vector<8xf32> to vector<8x1xf32>
    %70 = vector.broadcast %69 : vector<8x1xf32> to vector<8x8xf32>
    %71 = arith.subf %67, %70 : vector<8x8xf32>
    %72 = math.exp %71 : vector<8x8xf32>
    %cst_29 = arith.constant dense<0.000000e+00> : vector<8xf32>
    %73 = vector.multi_reduction <add>, %72, %cst_29 [1] : vector<8x8xf32> to vector<8xf32>
    %74 = vector.shape_cast %73 : vector<8xf32> to vector<8x1xf32>
    %75 = arith.truncf %72 : vector<8x8xf32> to vector<8x8xbf16>
    %76 = vector.extract_strided_slice %22 {offsets = [0, 16], sizes = [8, 8], strides = [1, 1]} : vector<8x32xbf16> to vector<8x8xbf16>
    %cst_30 = arith.constant dense<0.000000e+00> : vector<8x8xf32>
    %77 = tpu.matmul %75, %76, %cst_30 {dimension_numbers = #tpu.dot_dimension_numbers<[1], [0], [0], [1], [0, 0, 1, 1], [], []>} : vector<8x8xbf16>, vector<8x8xbf16>, vector<8x8xf32> -> vector<8x8xf32>
    %78 = vector.broadcast %74 : vector<8x1xf32> to vector<8x8xf32>
    %79 = arith.divf %77, %78 : vector<8x8xf32>
    %80 = vector.extract_strided_slice %20 {offsets = [0, 24], sizes = [8, 8], strides = [1, 1]} : vector<8x32xbf16> to vector<8x8xbf16>
    %81 = vector.extract_strided_slice %21 {offsets = [0, 24], sizes = [8, 8], strides = [1, 1]} : vector<8x32xbf16> to vector<8x8xbf16>
    %82 = tpu.transpose %81, [1, 0] : vector<8x8xbf16> -> vector<8x8xbf16>
    %cst_31 = arith.constant dense<0.000000e+00> : vector<8x8xf32>
    %83 = tpu.matmul %80, %82, %cst_31 {dimension_numbers = #tpu.dot_dimension_numbers<[1], [0], [0], [1], [0, 0, 1, 1], [], []>} : vector<8x8xbf16>, vector<8x8xbf16>, vector<8x8xf32> -> vector<8x8xf32>
    %cst_32 = arith.constant 0.353553385 : f32
    %84 = vector.broadcast %cst_32 : f32 to vector<8x8xf32>
    %85 = arith.mulf %83, %84 : vector<8x8xf32>
    %86 = arith.addf %85, %19 : vector<8x8xf32>
    %cst_33 = arith.constant dense<0xFF800000> : vector<8xf32>
    %87 = vector.multi_reduction <maximumf>, %86, %cst_33 [1] : vector<8x8xf32> to vector<8xf32>
    %88 = vector.shape_cast %87 : vector<8xf32> to vector<8x1xf32>
    %89 = vector.broadcast %88 : vector<8x1xf32> to vector<8x8xf32>
    %90 = arith.subf %86, %89 : vector<8x8xf32>
    %91 = math.exp %90 : vector<8x8xf32>
    %cst_34 = arith.constant dense<0.000000e+00> : vector<8xf32>
    %92 = vector.multi_reduction <add>, %91, %cst_34 [1] : vector<8x8xf32> to vector<8xf32>
    %93 = vector.shape_cast %92 : vector<8xf32> to vector<8x1xf32>
    %94 = arith.truncf %91 : vector<8x8xf32> to vector<8x8xbf16>
    %95 = vector.extract_strided_slice %22 {offsets = [0, 24], sizes = [8, 8], strides = [1, 1]} : vector<8x32xbf16> to vector<8x8xbf16>
    %cst_35 = arith.constant dense<0.000000e+00> : vector<8x8xf32>
    %96 = tpu.matmul %94, %95, %cst_35 {dimension_numbers = #tpu.dot_dimension_numbers<[1], [0], [0], [1], [0, 0, 1, 1], [], []>} : vector<8x8xbf16>, vector<8x8xbf16>, vector<8x8xf32> -> vector<8x8xf32>
    %97 = vector.broadcast %93 : vector<8x1xf32> to vector<8x8xf32>
    %98 = arith.divf %96, %97 : vector<8x8xf32>
    %99 = tpu.concatenate %41, %60, %79, %98 in 1 : vector<8x8xf32>, vector<8x8xf32>, vector<8x8xf32>, vector<8x8xf32> -> vector<8x32xf32>
    %100 = arith.truncf %99 : vector<8x32xf32> to vector<8x32xbf16>
    %cst_36 = arith.constant dense<0.000000e+00> : vector<8x32xf32>
    %101 = tpu.matmul %100, %9, %cst_36 {dimension_numbers = #tpu.dot_dimension_numbers<[1], [0], [0], [1], [0, 0, 1, 1], [], []>} : vector<8x32xbf16>, vector<32x32xbf16>, vector<8x32xf32> -> vector<8x32xf32>
    %102 = vector.broadcast %10 : vector<1x32xf32> to vector<8x32xf32>
    %103 = arith.addf %101, %102 : vector<8x32xf32>
    %104 = arith.addf %103, %8 : vector<8x32xf32>
    %cst_37 = arith.constant dense<0.000000e+00> : vector<8xf32>
    %105 = vector.multi_reduction <add>, %104, %cst_37 [1] : vector<8x32xf32> to vector<8xf32>
    %106 = vector.shape_cast %105 : vector<8xf32> to vector<8x1xf32>
    %cst_38 = arith.constant 3.200000e+01 : f32
    %107 = vector.broadcast %cst_38 : f32 to vector<8x1xf32>
    %108 = arith.divf %106, %107 : vector<8x1xf32>
    %109 = vector.broadcast %108 : vector<8x1xf32> to vector<8x32xf32>
    %110 = arith.subf %104, %109 : vector<8x32xf32>
    %111 = arith.mulf %110, %110 : vector<8x32xf32>
    %cst_39 = arith.constant dense<0.000000e+00> : vector<8xf32>
    %112 = vector.multi_reduction <add>, %111, %cst_39 [1] : vector<8x32xf32> to vector<8xf32>
    %113 = vector.shape_cast %112 : vector<8xf32> to vector<8x1xf32>
    %cst_40 = arith.constant 3.200000e+01 : f32
    %114 = vector.broadcast %cst_40 : f32 to vector<8x1xf32>
    %115 = arith.divf %113, %114 : vector<8x1xf32>
    %cst_41 = arith.constant 9.99999974E-6 : f32
    %116 = vector.broadcast %cst_41 : f32 to vector<8x1xf32>
    %117 = arith.addf %115, %116 : vector<8x1xf32>
    %118 = math.rsqrt %117 : vector<8x1xf32>
    %119 = vector.broadcast %118 : vector<8x1xf32> to vector<8x32xf32>
    %120 = arith.mulf %110, %119 : vector<8x32xf32>
    %121 = vector.broadcast %11 : vector<1x32xf32> to vector<8x32xf32>
    %122 = arith.mulf %120, %121 : vector<8x32xf32>
    %123 = vector.broadcast %12 : vector<1x32xf32> to vector<8x32xf32>
    %124 = arith.addf %122, %123 : vector<8x32xf32>
    %125 = vector.shape_cast %124 : vector<8x32xf32> to vector<1x8x32xf32>
    %c0_42 = arith.constant 0 : index
    %c0_43 = arith.constant 0 : index
    %c0_44 = arith.constant 0 : index
    %126 = vector.load %arg8[%c0_42, %c0_43, %c0_44] : memref<1x8x32xf32, #tpu.memory_space<vmem>>, vector<1x8x32xf32>
    tpu.vector_store %arg8[%c0_42, %c0_43, %c0_44], %125 {strides = array<i32>} : memref<1x8x32xf32, #tpu.memory_space<vmem>>, vector<1x8x32xf32>,
    return
  }
  func.func @transform_0(%arg0: i32) -> (i32, i32, i32) {
    %c0_i32 = arith.constant 0 : i32
    %c0_i32_0 = arith.constant 0 : i32
    %c0_i32_1 = arith.constant 0 : i32
    return %arg0, %c0_i32, %c0_i32_0 : i32, i32, i32
  }
  func.func @transform_1(%arg0: i32) -> (i32, i32, i32) {
    %c0_i32 = arith.constant 0 : i32
    %c0_i32_0 = arith.constant 0 : i32
    %c0_i32_1 = arith.constant 0 : i32
    return %arg0, %c0_i32, %c0_i32_0 : i32, i32, i32
  }
  func.func @transform_2(%arg0: i32) -> (i32, i32, i32) {
    %c0_i32 = arith.constant 0 : i32
    %c0_i32_0 = arith.constant 0 : i32
    %c0_i32_1 = arith.constant 0 : i32
    return %arg0, %c0_i32, %c0_i32_0 : i32, i32, i32
  }
  func.func @transform_3(%arg0: i32) -> (i32, i32) {
    %c0_i32 = arith.constant 0 : i32
    %c0_i32_0 = arith.constant 0 : i32
    %c0_i32_1 = arith.constant 0 : i32
    return %c0_i32, %c0_i32_0 : i32, i32
  }
  func.func @transform_4(%arg0: i32) -> (i32, i32) {
    %c0_i32 = arith.constant 0 : i32
    %c0_i32_0 = arith.constant 0 : i32
    %c0_i32_1 = arith.constant 0 : i32
    return %c0_i32, %c0_i32_0 : i32, i32
  }
  func.func @transform_5(%arg0: i32) -> (i32, i32) {
    %c0_i32 = arith.constant 0 : i32
    %c0_i32_0 = arith.constant 0 : i32
    %c0_i32_1 = arith.constant 0 : i32
    return %c0_i32, %c0_i32_0 : i32, i32
  }
  func.func @transform_6(%arg0: i32) -> (i32, i32) {
    %c0_i32 = arith.constant 0 : i32
    %c0_i32_0 = arith.constant 0 : i32
    %c0_i32_1 = arith.constant 0 : i32
    return %c0_i32, %c0_i32_0 : i32, i32
  }
  func.func @transform_7(%arg0: i32) -> (i32, i32, i32) {
    %c0_i32 = arith.constant 0 : i32
    %c0_i32_0 = arith.constant 0 : i32
    %c0_i32_1 = arith.constant 0 : i32
    return %arg0, %c0_i32, %c0_i32_0 : i32, i32, i32
  }
}

module attributes {stable_mosaic.version = 11 : i64} {
  func.func @_linear_kernel(%arg0: i32, %arg1: i32, %arg2: i32, %arg3: memref<16x32xf32, #tpu.memory_space<vmem>>, %arg4: memref<32x32xbf16, #tpu.memory_space<vmem>>, %arg5: memref<1x32xf32, #tpu.memory_space<vmem>>, %arg6: memref<16x32xf32, #tpu.memory_space<vmem>>, %arg7: memref<16x32xf32, #tpu.memory_space<vmem>>) attributes {dimension_semantics = [#tpu.dimension_semantics<parallel>, #tpu.dimension_semantics<parallel>, #tpu.dimension_semantics<arbitrary>], iteration_bounds = array<i64: 1, 1, 1>, scalar_prefetch = 0 : i64, scratch_operands = 1 : i64, tpu.core_type = #tpu.core_type<tc>, window_params = [{transform_indices = @transform_0, window_bounds = array<i64: 16, 32>}, {transform_indices = @transform_1, window_bounds = array<i64: 32, 32>}, {transform_indices = @transform_2, window_bounds = array<i64: 1, 32>}, {transform_indices = @transform_3, window_bounds = array<i64: 16, 32>}]} {
    %c0_i32 = arith.constant 0 : i32
    %0 = arith.cmpi eq, %arg2, %c0_i32 : i32
    %1 = arith.extui %0 : i1 to i32
    %c0_i32_0 = arith.constant 0 : i32
    %2 = arith.cmpi ne, %1, %c0_i32_0 : i32
    scf.if %2 {
      %cst_10 = arith.constant 0.000000e+00 : f32
      %13 = vector.broadcast %cst_10 : f32 to vector<16x32xf32>
      %c0_11 = arith.constant 0 : index
      %c0_12 = arith.constant 0 : index
      %14 = vector.load %arg7[%c0_11, %c0_12] : memref<16x32xf32, #tpu.memory_space<vmem>>, vector<16x32xf32>
      tpu.vector_store %arg7[%c0_11, %c0_12], %13 {strides = array<i32>} : memref<16x32xf32, #tpu.memory_space<vmem>>, vector<16x32xf32>,
    } else {
    }
    %c0 = arith.constant 0 : index
    %c0_1 = arith.constant 0 : index
    %3 = vector.load %arg7[%c0, %c0_1] : memref<16x32xf32, #tpu.memory_space<vmem>>, vector<16x32xf32>
    %c0_2 = arith.constant 0 : index
    %c0_3 = arith.constant 0 : index
    %4 = vector.load %arg3[%c0_2, %c0_3] : memref<16x32xf32, #tpu.memory_space<vmem>>, vector<16x32xf32>
    %5 = arith.truncf %4 : vector<16x32xf32> to vector<16x32xbf16>
    %c0_4 = arith.constant 0 : index
    %c0_5 = arith.constant 0 : index
    %6 = vector.load %arg4[%c0_4, %c0_5] : memref<32x32xbf16, #tpu.memory_space<vmem>>, vector<32x32xbf16>
    %cst = arith.constant dense<0.000000e+00> : vector<16x32xf32>
    %7 = tpu.matmul %5, %6, %cst {dimension_numbers = #tpu.dot_dimension_numbers<[1], [0], [0], [1], [0, 0, 1, 1], [], []>} : vector<16x32xbf16>, vector<32x32xbf16>, vector<16x32xf32> -> vector<16x32xf32>
    %8 = arith.addf %3, %7 : vector<16x32xf32>
    %c0_6 = arith.constant 0 : index
    %c0_7 = arith.constant 0 : index
    %9 = vector.load %arg7[%c0_6, %c0_7] : memref<16x32xf32, #tpu.memory_space<vmem>>, vector<16x32xf32>
    tpu.vector_store %arg7[%c0_6, %c0_7], %8 {strides = array<i32>} : memref<16x32xf32, #tpu.memory_space<vmem>>, vector<16x32xf32>,
    %c0_i32_8 = arith.constant 0 : i32
    %10 = arith.cmpi eq, %arg2, %c0_i32_8 : i32
    %11 = arith.extui %10 : i1 to i32
    %c0_i32_9 = arith.constant 0 : i32
    %12 = arith.cmpi ne, %11, %c0_i32_9 : i32
    scf.if %12 {
      %c0_10 = arith.constant 0 : index
      %c0_11 = arith.constant 0 : index
      %13 = vector.load %arg7[%c0_10, %c0_11] : memref<16x32xf32, #tpu.memory_space<vmem>>, vector<16x32xf32>
      %c0_12 = arith.constant 0 : index
      %c0_13 = arith.constant 0 : index
      %14 = vector.load %arg5[%c0_12, %c0_13] : memref<1x32xf32, #tpu.memory_space<vmem>>, vector<1x32xf32>
      %15 = vector.broadcast %14 : vector<1x32xf32> to vector<16x32xf32>
      %16 = arith.addf %13, %15 : vector<16x32xf32>
      %c0_14 = arith.constant 0 : index
      %c0_15 = arith.constant 0 : index
      %17 = vector.load %arg6[%c0_14, %c0_15] : memref<16x32xf32, #tpu.memory_space<vmem>>, vector<16x32xf32>
      tpu.vector_store %arg6[%c0_14, %c0_15], %16 {strides = array<i32>} : memref<16x32xf32, #tpu.memory_space<vmem>>, vector<16x32xf32>,
    } else {
    }
    return
  }
  func.func @transform_0(%arg0: i32, %arg1: i32, %arg2: i32) -> (i32, i32) {
    %c0_i32 = arith.constant 0 : i32
    return %arg0, %arg2 : i32, i32
  }
  func.func @transform_1(%arg0: i32, %arg1: i32, %arg2: i32) -> (i32, i32) {
    %c0_i32 = arith.constant 0 : i32
    return %arg2, %arg1 : i32, i32
  }
  func.func @transform_2(%arg0: i32, %arg1: i32, %arg2: i32) -> (i32, i32) {
    %c0_i32 = arith.constant 0 : i32
    %c0_i32_0 = arith.constant 0 : i32
    return %c0_i32, %arg1 : i32, i32
  }
  func.func @transform_3(%arg0: i32, %arg1: i32, %arg2: i32) -> (i32, i32) {
    %c0_i32 = arith.constant 0 : i32
    return %arg0, %arg1 : i32, i32
  }
}

module attributes {stable_mosaic.version = 11 : i64} {
  func.func @_linear_kernel(%arg0: i32, %arg1: i32, %arg2: i32, %arg3: memref<16x32xf32, #tpu.memory_space<vmem>>, %arg4: memref<32x64xbf16, #tpu.memory_space<vmem>>, %arg5: memref<1x64xf32, #tpu.memory_space<vmem>>, %arg6: memref<16x64xf32, #tpu.memory_space<vmem>>, %arg7: memref<16x64xf32, #tpu.memory_space<vmem>>) attributes {dimension_semantics = [#tpu.dimension_semantics<parallel>, #tpu.dimension_semantics<parallel>, #tpu.dimension_semantics<arbitrary>], iteration_bounds = array<i64: 1, 1, 1>, scalar_prefetch = 0 : i64, scratch_operands = 1 : i64, tpu.core_type = #tpu.core_type<tc>, window_params = [{transform_indices = @transform_0, window_bounds = array<i64: 16, 32>}, {transform_indices = @transform_1, window_bounds = array<i64: 32, 64>}, {transform_indices = @transform_2, window_bounds = array<i64: 1, 64>}, {transform_indices = @transform_3, window_bounds = array<i64: 16, 64>}]} {
    %c0_i32 = arith.constant 0 : i32
    %0 = arith.cmpi eq, %arg2, %c0_i32 : i32
    %1 = arith.extui %0 : i1 to i32
    %c0_i32_0 = arith.constant 0 : i32
    %2 = arith.cmpi ne, %1, %c0_i32_0 : i32
    scf.if %2 {
      %cst_10 = arith.constant 0.000000e+00 : f32
      %13 = vector.broadcast %cst_10 : f32 to vector<16x64xf32>
      %c0_11 = arith.constant 0 : index
      %c0_12 = arith.constant 0 : index
      %14 = vector.load %arg7[%c0_11, %c0_12] : memref<16x64xf32, #tpu.memory_space<vmem>>, vector<16x64xf32>
      tpu.vector_store %arg7[%c0_11, %c0_12], %13 {strides = array<i32>} : memref<16x64xf32, #tpu.memory_space<vmem>>, vector<16x64xf32>,
    } else {
    }
    %c0 = arith.constant 0 : index
    %c0_1 = arith.constant 0 : index
    %3 = vector.load %arg7[%c0, %c0_1] : memref<16x64xf32, #tpu.memory_space<vmem>>, vector<16x64xf32>
    %c0_2 = arith.constant 0 : index
    %c0_3 = arith.constant 0 : index
    %4 = vector.load %arg3[%c0_2, %c0_3] : memref<16x32xf32, #tpu.memory_space<vmem>>, vector<16x32xf32>
    %5 = arith.truncf %4 : vector<16x32xf32> to vector<16x32xbf16>
    %c0_4 = arith.constant 0 : index
    %c0_5 = arith.constant 0 : index
    %6 = vector.load %arg4[%c0_4, %c0_5] : memref<32x64xbf16, #tpu.memory_space<vmem>>, vector<32x64xbf16>
    %cst = arith.constant dense<0.000000e+00> : vector<16x64xf32>
    %7 = tpu.matmul %5, %6, %cst {dimension_numbers = #tpu.dot_dimension_numbers<[1], [0], [0], [1], [0, 0, 1, 1], [], []>} : vector<16x32xbf16>, vector<32x64xbf16>, vector<16x64xf32> -> vector<16x64xf32>
    %8 = arith.addf %3, %7 : vector<16x64xf32>
    %c0_6 = arith.constant 0 : index
    %c0_7 = arith.constant 0 : index
    %9 = vector.load %arg7[%c0_6, %c0_7] : memref<16x64xf32, #tpu.memory_space<vmem>>, vector<16x64xf32>
    tpu.vector_store %arg7[%c0_6, %c0_7], %8 {strides = array<i32>} : memref<16x64xf32, #tpu.memory_space<vmem>>, vector<16x64xf32>,
    %c0_i32_8 = arith.constant 0 : i32
    %10 = arith.cmpi eq, %arg2, %c0_i32_8 : i32
    %11 = arith.extui %10 : i1 to i32
    %c0_i32_9 = arith.constant 0 : i32
    %12 = arith.cmpi ne, %11, %c0_i32_9 : i32
    scf.if %12 {
      %c0_10 = arith.constant 0 : index
      %c0_11 = arith.constant 0 : index
      %13 = vector.load %arg7[%c0_10, %c0_11] : memref<16x64xf32, #tpu.memory_space<vmem>>, vector<16x64xf32>
      %c0_12 = arith.constant 0 : index
      %c0_13 = arith.constant 0 : index
      %14 = vector.load %arg5[%c0_12, %c0_13] : memref<1x64xf32, #tpu.memory_space<vmem>>, vector<1x64xf32>
      %15 = vector.broadcast %14 : vector<1x64xf32> to vector<16x64xf32>
      %16 = arith.addf %13, %15 : vector<16x64xf32>
      %c0_14 = arith.constant 0 : index
      %c0_15 = arith.constant 0 : index
      %17 = vector.load %arg6[%c0_14, %c0_15] : memref<16x64xf32, #tpu.memory_space<vmem>>, vector<16x64xf32>
      tpu.vector_store %arg6[%c0_14, %c0_15], %16 {strides = array<i32>} : memref<16x64xf32, #tpu.memory_space<vmem>>, vector<16x64xf32>,
    } else {
    }
    return
  }
  func.func @transform_0(%arg0: i32, %arg1: i32, %arg2: i32) -> (i32, i32) {
    %c0_i32 = arith.constant 0 : i32
    return %arg0, %arg2 : i32, i32
  }
  func.func @transform_1(%arg0: i32, %arg1: i32, %arg2: i32) -> (i32, i32) {
    %c0_i32 = arith.constant 0 : i32
    return %arg2, %arg1 : i32, i32
  }
  func.func @transform_2(%arg0: i32, %arg1: i32, %arg2: i32) -> (i32, i32) {
    %c0_i32 = arith.constant 0 : i32
    %c0_i32_0 = arith.constant 0 : i32
    return %c0_i32, %arg1 : i32, i32
  }
  func.func @transform_3(%arg0: i32, %arg1: i32, %arg2: i32) -> (i32, i32) {
    %c0_i32 = arith.constant 0 : i32
    return %arg0, %arg1 : i32, i32
  }
}

module attributes {stable_mosaic.version = 11 : i64} {
  func.func @_ffn_ln_kernel(%arg0: i32, %arg1: i32, %arg2: memref<16x32xf32, #tpu.memory_space<vmem>>, %arg3: memref<32x64xbf16, #tpu.memory_space<vmem>>, %arg4: memref<1x64xf32, #tpu.memory_space<vmem>>, %arg5: memref<64x32xbf16, #tpu.memory_space<vmem>>, %arg6: memref<1x32xf32, #tpu.memory_space<vmem>>, %arg7: memref<16x32xf32, #tpu.memory_space<vmem>>, %arg8: memref<1x32xf32, #tpu.memory_space<vmem>>, %arg9: memref<1x32xf32, #tpu.memory_space<vmem>>, %arg10: memref<16x32xf32, #tpu.memory_space<vmem>>, %arg11: memref<16x32xf32, #tpu.memory_space<vmem>>) attributes {dimension_semantics = [#tpu.dimension_semantics<parallel>, #tpu.dimension_semantics<arbitrary>], iteration_bounds = array<i64: 1, 1>, scalar_prefetch = 0 : i64, scratch_operands = 1 : i64, tpu.core_type = #tpu.core_type<tc>, window_params = [{transform_indices = @transform_0, window_bounds = array<i64: 16, 32>}, {transform_indices = @transform_1, window_bounds = array<i64: 32, 64>}, {transform_indices = @transform_2, window_bounds = array<i64: 1, 64>}, {transform_indices = @transform_3, window_bounds = array<i64: 64, 32>}, {pipeline_mode = #tpu.pipeline_mode<synchronous>, transform_indices = @transform_4, window_bounds = array<i64: 1, 32>}, {transform_indices = @transform_5, window_bounds = array<i64: 16, 32>}, {pipeline_mode = #tpu.pipeline_mode<synchronous>, transform_indices = @transform_6, window_bounds = array<i64: 1, 32>}, {pipeline_mode = #tpu.pipeline_mode<synchronous>, transform_indices = @transform_7, window_bounds = array<i64: 1, 32>}, {transform_indices = @transform_8, window_bounds = array<i64: 16, 32>}]} {
    %c0_i32 = arith.constant 0 : i32
    %0 = arith.cmpi eq, %arg1, %c0_i32 : i32
    %1 = arith.extui %0 : i1 to i32
    %c0_i32_0 = arith.constant 0 : i32
    %2 = arith.cmpi ne, %1, %c0_i32_0 : i32
    scf.if %2 {
      %cst_18 = arith.constant 0.000000e+00 : f32
      %27 = vector.broadcast %cst_18 : f32 to vector<16x32xf32>
      %c0_19 = arith.constant 0 : index
      %c0_20 = arith.constant 0 : index
      %28 = vector.load %arg11[%c0_19, %c0_20] : memref<16x32xf32, #tpu.memory_space<vmem>>, vector<16x32xf32>
      tpu.vector_store %arg11[%c0_19, %c0_20], %27 {strides = array<i32>} : memref<16x32xf32, #tpu.memory_space<vmem>>, vector<16x32xf32>,
    } else {
    }
    %c0 = arith.constant 0 : index
    %c0_1 = arith.constant 0 : index
    %3 = vector.load %arg2[%c0, %c0_1] : memref<16x32xf32, #tpu.memory_space<vmem>>, vector<16x32xf32>
    %4 = arith.truncf %3 : vector<16x32xf32> to vector<16x32xbf16>
    %c0_2 = arith.constant 0 : index
    %c0_3 = arith.constant 0 : index
    %5 = vector.load %arg3[%c0_2, %c0_3] : memref<32x64xbf16, #tpu.memory_space<vmem>>, vector<32x64xbf16>
    %cst = arith.constant dense<0.000000e+00> : vector<16x64xf32>
    %6 = tpu.matmul %4, %5, %cst {dimension_numbers = #tpu.dot_dimension_numbers<[1], [0], [0], [1], [0, 0, 1, 1], [], []>} : vector<16x32xbf16>, vector<32x64xbf16>, vector<16x64xf32> -> vector<16x64xf32>
    %c0_4 = arith.constant 0 : index
    %c0_5 = arith.constant 0 : index
    %7 = vector.load %arg4[%c0_4, %c0_5] : memref<1x64xf32, #tpu.memory_space<vmem>>, vector<1x64xf32>
    %8 = vector.broadcast %7 : vector<1x64xf32> to vector<16x64xf32>
    %9 = arith.addf %6, %8 : vector<16x64xf32>
    %cst_6 = arith.constant 5.000000e-01 : f32
    %10 = vector.broadcast %cst_6 : f32 to vector<16x64xf32>
    %11 = arith.mulf %10, %9 : vector<16x64xf32>
    %cst_7 = arith.constant 0.707106769 : f32
    %12 = vector.broadcast %cst_7 : f32 to vector<16x64xf32>
    %13 = arith.mulf %9, %12 : vector<16x64xf32>
    %14 = math.erf %13 : vector<16x64xf32>
    %cst_8 = arith.constant 1.000000e+00 : f32
    %15 = vector.broadcast %cst_8 : f32 to vector<16x64xf32>
    %16 = arith.addf %15, %14 : vector<16x64xf32>
    %17 = arith.mulf %11, %16 : vector<16x64xf32>
    %c0_9 = arith.constant 0 : index
    %c0_10 = arith.constant 0 : index
    %18 = vector.load %arg11[%c0_9, %c0_10] : memref<16x32xf32, #tpu.memory_space<vmem>>, vector<16x32xf32>
    %19 = arith.truncf %17 : vector<16x64xf32> to vector<16x64xbf16>
    %c0_11 = arith.constant 0 : index
    %c0_12 = arith.constant 0 : index
    %20 = vector.load %arg5[%c0_11, %c0_12] : memref<64x32xbf16, #tpu.memory_space<vmem>>, vector<64x32xbf16>
    %cst_13 = arith.constant dense<0.000000e+00> : vector<16x32xf32>
    %21 = tpu.matmul %19, %20, %cst_13 {dimension_numbers = #tpu.dot_dimension_numbers<[1], [0], [0], [1], [0, 0, 1, 1], [], []>} : vector<16x64xbf16>, vector<64x32xbf16>, vector<16x32xf32> -> vector<16x32xf32>
    %22 = arith.addf %18, %21 : vector<16x32xf32>
    %c0_14 = arith.constant 0 : index
    %c0_15 = arith.constant 0 : index
    %23 = vector.load %arg11[%c0_14, %c0_15] : memref<16x32xf32, #tpu.memory_space<vmem>>, vector<16x32xf32>
    tpu.vector_store %arg11[%c0_14, %c0_15], %22 {strides = array<i32>} : memref<16x32xf32, #tpu.memory_space<vmem>>, vector<16x32xf32>,
    %c0_i32_16 = arith.constant 0 : i32
    %24 = arith.cmpi eq, %arg1, %c0_i32_16 : i32
    %25 = arith.extui %24 : i1 to i32
    %c0_i32_17 = arith.constant 0 : i32
    %26 = arith.cmpi ne, %25, %c0_i32_17 : i32
    scf.if %26 {
      %c0_18 = arith.constant 0 : index
      %c0_19 = arith.constant 0 : index
      %27 = vector.load %arg11[%c0_18, %c0_19] : memref<16x32xf32, #tpu.memory_space<vmem>>, vector<16x32xf32>
      %c0_20 = arith.constant 0 : index
      %c0_21 = arith.constant 0 : index
      %28 = vector.load %arg6[%c0_20, %c0_21] : memref<1x32xf32, #tpu.memory_space<vmem>>, vector<1x32xf32>
      %29 = vector.broadcast %28 : vector<1x32xf32> to vector<16x32xf32>
      %30 = arith.addf %27, %29 : vector<16x32xf32>
      %c0_22 = arith.constant 0 : index
      %c0_23 = arith.constant 0 : index
      %31 = vector.load %arg7[%c0_22, %c0_23] : memref<16x32xf32, #tpu.memory_space<vmem>>, vector<16x32xf32>
      %32 = arith.addf %30, %31 : vector<16x32xf32>
      %c0_24 = arith.constant 0 : index
      %c0_25 = arith.constant 0 : index
      %33 = vector.load %arg8[%c0_24, %c0_25] : memref<1x32xf32, #tpu.memory_space<vmem>>, vector<1x32xf32>
      %c0_26 = arith.constant 0 : index
      %c0_27 = arith.constant 0 : index
      %34 = vector.load %arg9[%c0_26, %c0_27] : memref<1x32xf32, #tpu.memory_space<vmem>>, vector<1x32xf32>
      %cst_28 = arith.constant dense<0.000000e+00> : vector<16xf32>
      %35 = vector.multi_reduction <add>, %32, %cst_28 [1] : vector<16x32xf32> to vector<16xf32>
      %36 = vector.shape_cast %35 : vector<16xf32> to vector<16x1xf32>
      %cst_29 = arith.constant 3.200000e+01 : f32
      %37 = vector.broadcast %cst_29 : f32 to vector<16x1xf32>
      %38 = arith.divf %36, %37 : vector<16x1xf32>
      %39 = vector.broadcast %38 : vector<16x1xf32> to vector<16x32xf32>
      %40 = arith.subf %32, %39 : vector<16x32xf32>
      %41 = arith.mulf %40, %40 : vector<16x32xf32>
      %cst_30 = arith.constant dense<0.000000e+00> : vector<16xf32>
      %42 = vector.multi_reduction <add>, %41, %cst_30 [1] : vector<16x32xf32> to vector<16xf32>
      %43 = vector.shape_cast %42 : vector<16xf32> to vector<16x1xf32>
      %cst_31 = arith.constant 3.200000e+01 : f32
      %44 = vector.broadcast %cst_31 : f32 to vector<16x1xf32>
      %45 = arith.divf %43, %44 : vector<16x1xf32>
      %cst_32 = arith.constant 9.99999974E-6 : f32
      %46 = vector.broadcast %cst_32 : f32 to vector<16x1xf32>
      %47 = arith.addf %45, %46 : vector<16x1xf32>
      %48 = math.rsqrt %47 : vector<16x1xf32>
      %49 = vector.broadcast %48 : vector<16x1xf32> to vector<16x32xf32>
      %50 = arith.mulf %40, %49 : vector<16x32xf32>
      %51 = vector.broadcast %33 : vector<1x32xf32> to vector<16x32xf32>
      %52 = arith.mulf %50, %51 : vector<16x32xf32>
      %53 = vector.broadcast %34 : vector<1x32xf32> to vector<16x32xf32>
      %54 = arith.addf %52, %53 : vector<16x32xf32>
      %c0_33 = arith.constant 0 : index
      %c0_34 = arith.constant 0 : index
      %55 = vector.load %arg10[%c0_33, %c0_34] : memref<16x32xf32, #tpu.memory_space<vmem>>, vector<16x32xf32>
      tpu.vector_store %arg10[%c0_33, %c0_34], %54 {strides = array<i32>} : memref<16x32xf32, #tpu.memory_space<vmem>>, vector<16x32xf32>,
    } else {
    }
    return
  }
  func.func @transform_0(%arg0: i32, %arg1: i32) -> (i32, i32) {
    %c0_i32 = arith.constant 0 : i32
    %c0_i32_0 = arith.constant 0 : i32
    return %arg0, %c0_i32 : i32, i32
  }
  func.func @transform_1(%arg0: i32, %arg1: i32) -> (i32, i32) {
    %c0_i32 = arith.constant 0 : i32
    %c0_i32_0 = arith.constant 0 : i32
    return %c0_i32, %arg1 : i32, i32
  }
  func.func @transform_2(%arg0: i32, %arg1: i32) -> (i32, i32) {
    %c0_i32 = arith.constant 0 : i32
    %c0_i32_0 = arith.constant 0 : i32
    return %c0_i32, %arg1 : i32, i32
  }
  func.func @transform_3(%arg0: i32, %arg1: i32) -> (i32, i32) {
    %c0_i32 = arith.constant 0 : i32
    %c0_i32_0 = arith.constant 0 : i32
    return %arg1, %c0_i32 : i32, i32
  }
  func.func @transform_4(%arg0: i32, %arg1: i32) -> (i32, i32) {
    %c0_i32 = arith.constant 0 : i32
    %c0_i32_0 = arith.constant 0 : i32
    %c0_i32_1 = arith.constant 0 : i32
    return %c0_i32, %c0_i32_0 : i32, i32
  }
  func.func @transform_5(%arg0: i32, %arg1: i32) -> (i32, i32) {
    %c0_i32 = arith.constant 0 : i32
    %c0_i32_0 = arith.constant 0 : i32
    return %arg0, %c0_i32 : i32, i32
  }
  func.func @transform_6(%arg0: i32, %arg1: i32) -> (i32, i32) {
    %c0_i32 = arith.constant 0 : i32
    %c0_i32_0 = arith.constant 0 : i32
    %c0_i32_1 = arith.constant 0 : i32
    return %c0_i32, %c0_i32_0 : i32, i32
  }
  func.func @transform_7(%arg0: i32, %arg1: i32) -> (i32, i32) {
    %c0_i32 = arith.constant 0 : i32
    %c0_i32_0 = arith.constant 0 : i32
    %c0_i32_1 = arith.constant 0 : i32
    return %c0_i32, %c0_i32_0 : i32, i32
  }
  func.func @transform_8(%arg0: i32, %arg1: i32) -> (i32, i32) {
    %c0_i32 = arith.constant 0 : i32
    %c0_i32_0 = arith.constant 0 : i32
    return %arg0, %c0_i32 : i32, i32
  }
}

module attributes {stable_mosaic.version = 11 : i64} {
  func.func @_cross_attn_ln_kernel(%arg0: i32, %arg1: memref<1x8x32xf32, #tpu.memory_space<vmem>>, %arg2: memref<1x8x64xf32, #tpu.memory_space<vmem>>, %arg3: memref<1x8x32xf32, #tpu.memory_space<vmem>>, %arg4: memref<1x1x8xf32, #tpu.memory_space<vmem>>, %arg5: memref<32x32xbf16, #tpu.memory_space<vmem>>, %arg6: memref<1x32xf32, #tpu.memory_space<vmem>>, %arg7: memref<1x32xf32, #tpu.memory_space<vmem>>, %arg8: memref<1x32xf32, #tpu.memory_space<vmem>>, %arg9: memref<1x8x32xf32, #tpu.memory_space<vmem>>) attributes {dimension_semantics = [#tpu.dimension_semantics<parallel>], iteration_bounds = array<i64: 2>, scalar_prefetch = 0 : i64, scratch_operands = 0 : i64, tpu.core_type = #tpu.core_type<tc>, window_params = [{transform_indices = @transform_0, window_bounds = array<i64: 1, 8, 32>}, {transform_indices = @transform_1, window_bounds = array<i64: 1, 8, 64>}, {transform_indices = @transform_2, window_bounds = array<i64: 1, 8, 32>}, {transform_indices = @transform_3, window_bounds = array<i64: 1, 1, 8>}, {pipeline_mode = #tpu.pipeline_mode<synchronous>, transform_indices = @transform_4, window_bounds = array<i64: 32, 32>}, {pipeline_mode = #tpu.pipeline_mode<synchronous>, transform_indices = @transform_5, window_bounds = array<i64: 1, 32>}, {pipeline_mode = #tpu.pipeline_mode<synchronous>, transform_indices = @transform_6, window_bounds = array<i64: 1, 32>}, {pipeline_mode = #tpu.pipeline_mode<synchronous>, transform_indices = @transform_7, window_bounds = array<i64: 1, 32>}, {transform_indices = @transform_8, window_bounds = array<i64: 1, 8, 32>}]} {
    %c0 = arith.constant 0 : index
    %c0_0 = arith.constant 0 : index
    %c0_1 = arith.constant 0 : index
    %0 = vector.load %arg2[%c0, %c0_0, %c0_1] : memref<1x8x64xf32, #tpu.memory_space<vmem>>, vector<1x8x64xf32>
    %1 = vector.shape_cast %0 : vector<1x8x64xf32> to vector<8x64xf32>
    %c0_2 = arith.constant 0 : index
    %c0_3 = arith.constant 0 : index
    %c0_4 = arith.constant 0 : index
    %2 = vector.load %arg1[%c0_2, %c0_3, %c0_4] : memref<1x8x32xf32, #tpu.memory_space<vmem>>, vector<1x8x32xf32>
    %3 = vector.shape_cast %2 : vector<1x8x32xf32> to vector<8x32xf32>
    %4 = vector.extract_strided_slice %1 {offsets = [0, 0], sizes = [8, 32], strides = [1, 1]} : vector<8x64xf32> to vector<8x32xf32>
    %5 = vector.extract_strided_slice %1 {offsets = [0, 32], sizes = [8, 32], strides = [1, 1]} : vector<8x64xf32> to vector<8x32xf32>
    %c0_5 = arith.constant 0 : index
    %c0_6 = arith.constant 0 : index
    %c0_7 = arith.constant 0 : index
    %6 = vector.load %arg4[%c0_5, %c0_6, %c0_7] : memref<1x1x8xf32, #tpu.memory_space<vmem>>, vector<1x1x8xf32>
    %7 = vector.shape_cast %6 : vector<1x1x8xf32> to vector<1x8xf32>
    %c0_8 = arith.constant 0 : index
    %c0_9 = arith.constant 0 : index
    %c0_10 = arith.constant 0 : index
    %8 = vector.load %arg3[%c0_8, %c0_9, %c0_10] : memref<1x8x32xf32, #tpu.memory_space<vmem>>, vector<1x8x32xf32>
    %9 = vector.shape_cast %8 : vector<1x8x32xf32> to vector<8x32xf32>
    %c0_11 = arith.constant 0 : index
    %c0_12 = arith.constant 0 : index
    %10 = vector.load %arg5[%c0_11, %c0_12] : memref<32x32xbf16, #tpu.memory_space<vmem>>, vector<32x32xbf16>
    %c0_13 = arith.constant 0 : index
    %c0_14 = arith.constant 0 : index
    %11 = vector.load %arg6[%c0_13, %c0_14] : memref<1x32xf32, #tpu.memory_space<vmem>>, vector<1x32xf32>
    %c0_15 = arith.constant 0 : index
    %c0_16 = arith.constant 0 : index
    %12 = vector.load %arg7[%c0_15, %c0_16] : memref<1x32xf32, #tpu.memory_space<vmem>>, vector<1x32xf32>
    %c0_17 = arith.constant 0 : index
    %c0_18 = arith.constant 0 : index
    %13 = vector.load %arg8[%c0_17, %c0_18] : memref<1x32xf32, #tpu.memory_space<vmem>>, vector<1x32xf32>
    %14 = arith.truncf %3 : vector<8x32xf32> to vector<8x32xbf16>
    %15 = arith.truncf %4 : vector<8x32xf32> to vector<8x32xbf16>
    %16 = arith.truncf %5 : vector<8x32xf32> to vector<8x32xbf16>
    %17 = vector.extract_strided_slice %14 {offsets = [0, 0], sizes = [8, 8], strides = [1, 1]} : vector<8x32xbf16> to vector<8x8xbf16>
    %18 = vector.extract_strided_slice %15 {offsets = [0, 0], sizes = [8, 8], strides = [1, 1]} : vector<8x32xbf16> to vector<8x8xbf16>
    %19 = tpu.transpose %18, [1, 0] : vector<8x8xbf16> -> vector<8x8xbf16>
    %cst = arith.constant dense<0.000000e+00> : vector<8x8xf32>
    %20 = tpu.matmul %17, %19, %cst {dimension_numbers = #tpu.dot_dimension_numbers<[1], [0], [0], [1], [0, 0, 1, 1], [], []>} : vector<8x8xbf16>, vector<8x8xbf16>, vector<8x8xf32> -> vector<8x8xf32>
    %cst_19 = arith.constant 0.353553385 : f32
    %21 = vector.broadcast %cst_19 : f32 to vector<8x8xf32>
    %22 = arith.mulf %20, %21 : vector<8x8xf32>
    %23 = vector.broadcast %7 : vector<1x8xf32> to vector<8x8xf32>
    %24 = arith.addf %22, %23 : vector<8x8xf32>
    %cst_20 = arith.constant dense<0xFF800000> : vector<8xf32>
    %25 = vector.multi_reduction <maximumf>, %24, %cst_20 [1] : vector<8x8xf32> to vector<8xf32>
    %26 = vector.shape_cast %25 : vector<8xf32> to vector<8x1xf32>
    %27 = vector.broadcast %26 : vector<8x1xf32> to vector<8x8xf32>
    %28 = arith.subf %24, %27 : vector<8x8xf32>
    %29 = math.exp %28 : vector<8x8xf32>
    %cst_21 = arith.constant dense<0.000000e+00> : vector<8xf32>
    %30 = vector.multi_reduction <add>, %29, %cst_21 [1] : vector<8x8xf32> to vector<8xf32>
    %31 = vector.shape_cast %30 : vector<8xf32> to vector<8x1xf32>
    %32 = arith.truncf %29 : vector<8x8xf32> to vector<8x8xbf16>
    %33 = vector.extract_strided_slice %16 {offsets = [0, 0], sizes = [8, 8], strides = [1, 1]} : vector<8x32xbf16> to vector<8x8xbf16>
    %cst_22 = arith.constant dense<0.000000e+00> : vector<8x8xf32>
    %34 = tpu.matmul %32, %33, %cst_22 {dimension_numbers = #tpu.dot_dimension_numbers<[1], [0], [0], [1], [0, 0, 1, 1], [], []>} : vector<8x8xbf16>, vector<8x8xbf16>, vector<8x8xf32> -> vector<8x8xf32>
    %35 = vector.broadcast %31 : vector<8x1xf32> to vector<8x8xf32>
    %36 = arith.divf %34, %35 : vector<8x8xf32>
    %37 = vector.extract_strided_slice %14 {offsets = [0, 8], sizes = [8, 8], strides = [1, 1]} : vector<8x32xbf16> to vector<8x8xbf16>
    %38 = vector.extract_strided_slice %15 {offsets = [0, 8], sizes = [8, 8], strides = [1, 1]} : vector<8x32xbf16> to vector<8x8xbf16>
    %39 = tpu.transpose %38, [1, 0] : vector<8x8xbf16> -> vector<8x8xbf16>
    %cst_23 = arith.constant dense<0.000000e+00> : vector<8x8xf32>
    %40 = tpu.matmul %37, %39, %cst_23 {dimension_numbers = #tpu.dot_dimension_numbers<[1], [0], [0], [1], [0, 0, 1, 1], [], []>} : vector<8x8xbf16>, vector<8x8xbf16>, vector<8x8xf32> -> vector<8x8xf32>
    %cst_24 = arith.constant 0.353553385 : f32
    %41 = vector.broadcast %cst_24 : f32 to vector<8x8xf32>
    %42 = arith.mulf %40, %41 : vector<8x8xf32>
    %43 = vector.broadcast %7 : vector<1x8xf32> to vector<8x8xf32>
    %44 = arith.addf %42, %43 : vector<8x8xf32>
    %cst_25 = arith.constant dense<0xFF800000> : vector<8xf32>
    %45 = vector.multi_reduction <maximumf>, %44, %cst_25 [1] : vector<8x8xf32> to vector<8xf32>
    %46 = vector.shape_cast %45 : vector<8xf32> to vector<8x1xf32>
    %47 = vector.broadcast %46 : vector<8x1xf32> to vector<8x8xf32>
    %48 = arith.subf %44, %47 : vector<8x8xf32>
    %49 = math.exp %48 : vector<8x8xf32>
    %cst_26 = arith.constant dense<0.000000e+00> : vector<8xf32>
    %50 = vector.multi_reduction <add>, %49, %cst_26 [1] : vector<8x8xf32> to vector<8xf32>
    %51 = vector.shape_cast %50 : vector<8xf32> to vector<8x1xf32>
    %52 = arith.truncf %49 : vector<8x8xf32> to vector<8x8xbf16>
    %53 = vector.extract_strided_slice %16 {offsets = [0, 8], sizes = [8, 8], strides = [1, 1]} : vector<8x32xbf16> to vector<8x8xbf16>
    %cst_27 = arith.constant dense<0.000000e+00> : vector<8x8xf32>
    %54 = tpu.matmul %52, %53, %cst_27 {dimension_numbers = #tpu.dot_dimension_numbers<[1], [0], [0], [1], [0, 0, 1, 1], [], []>} : vector<8x8xbf16>, vector<8x8xbf16>, vector<8x8xf32> -> vector<8x8xf32>
    %55 = vector.broadcast %51 : vector<8x1xf32> to vector<8x8xf32>
    %56 = arith.divf %54, %55 : vector<8x8xf32>
    %57 = vector.extract_strided_slice %14 {offsets = [0, 16], sizes = [8, 8], strides = [1, 1]} : vector<8x32xbf16> to vector<8x8xbf16>
    %58 = vector.extract_strided_slice %15 {offsets = [0, 16], sizes = [8, 8], strides = [1, 1]} : vector<8x32xbf16> to vector<8x8xbf16>
    %59 = tpu.transpose %58, [1, 0] : vector<8x8xbf16> -> vector<8x8xbf16>
    %cst_28 = arith.constant dense<0.000000e+00> : vector<8x8xf32>
    %60 = tpu.matmul %57, %59, %cst_28 {dimension_numbers = #tpu.dot_dimension_numbers<[1], [0], [0], [1], [0, 0, 1, 1], [], []>} : vector<8x8xbf16>, vector<8x8xbf16>, vector<8x8xf32> -> vector<8x8xf32>
    %cst_29 = arith.constant 0.353553385 : f32
    %61 = vector.broadcast %cst_29 : f32 to vector<8x8xf32>
    %62 = arith.mulf %60, %61 : vector<8x8xf32>
    %63 = vector.broadcast %7 : vector<1x8xf32> to vector<8x8xf32>
    %64 = arith.addf %62, %63 : vector<8x8xf32>
    %cst_30 = arith.constant dense<0xFF800000> : vector<8xf32>
    %65 = vector.multi_reduction <maximumf>, %64, %cst_30 [1] : vector<8x8xf32> to vector<8xf32>
    %66 = vector.shape_cast %65 : vector<8xf32> to vector<8x1xf32>
    %67 = vector.broadcast %66 : vector<8x1xf32> to vector<8x8xf32>
    %68 = arith.subf %64, %67 : vector<8x8xf32>
    %69 = math.exp %68 : vector<8x8xf32>
    %cst_31 = arith.constant dense<0.000000e+00> : vector<8xf32>
    %70 = vector.multi_reduction <add>, %69, %cst_31 [1] : vector<8x8xf32> to vector<8xf32>
    %71 = vector.shape_cast %70 : vector<8xf32> to vector<8x1xf32>
    %72 = arith.truncf %69 : vector<8x8xf32> to vector<8x8xbf16>
    %73 = vector.extract_strided_slice %16 {offsets = [0, 16], sizes = [8, 8], strides = [1, 1]} : vector<8x32xbf16> to vector<8x8xbf16>
    %cst_32 = arith.constant dense<0.000000e+00> : vector<8x8xf32>
    %74 = tpu.matmul %72, %73, %cst_32 {dimension_numbers = #tpu.dot_dimension_numbers<[1], [0], [0], [1], [0, 0, 1, 1], [], []>} : vector<8x8xbf16>, vector<8x8xbf16>, vector<8x8xf32> -> vector<8x8xf32>
    %75 = vector.broadcast %71 : vector<8x1xf32> to vector<8x8xf32>
    %76 = arith.divf %74, %75 : vector<8x8xf32>
    %77 = vector.extract_strided_slice %14 {offsets = [0, 24], sizes = [8, 8], strides = [1, 1]} : vector<8x32xbf16> to vector<8x8xbf16>
    %78 = vector.extract_strided_slice %15 {offsets = [0, 24], sizes = [8, 8], strides = [1, 1]} : vector<8x32xbf16> to vector<8x8xbf16>
    %79 = tpu.transpose %78, [1, 0] : vector<8x8xbf16> -> vector<8x8xbf16>
    %cst_33 = arith.constant dense<0.000000e+00> : vector<8x8xf32>
    %80 = tpu.matmul %77, %79, %cst_33 {dimension_numbers = #tpu.dot_dimension_numbers<[1], [0], [0], [1], [0, 0, 1, 1], [], []>} : vector<8x8xbf16>, vector<8x8xbf16>, vector<8x8xf32> -> vector<8x8xf32>
    %cst_34 = arith.constant 0.353553385 : f32
    %81 = vector.broadcast %cst_34 : f32 to vector<8x8xf32>
    %82 = arith.mulf %80, %81 : vector<8x8xf32>
    %83 = vector.broadcast %7 : vector<1x8xf32> to vector<8x8xf32>
    %84 = arith.addf %82, %83 : vector<8x8xf32>
    %cst_35 = arith.constant dense<0xFF800000> : vector<8xf32>
    %85 = vector.multi_reduction <maximumf>, %84, %cst_35 [1] : vector<8x8xf32> to vector<8xf32>
    %86 = vector.shape_cast %85 : vector<8xf32> to vector<8x1xf32>
    %87 = vector.broadcast %86 : vector<8x1xf32> to vector<8x8xf32>
    %88 = arith.subf %84, %87 : vector<8x8xf32>
    %89 = math.exp %88 : vector<8x8xf32>
    %cst_36 = arith.constant dense<0.000000e+00> : vector<8xf32>
    %90 = vector.multi_reduction <add>, %89, %cst_36 [1] : vector<8x8xf32> to vector<8xf32>
    %91 = vector.shape_cast %90 : vector<8xf32> to vector<8x1xf32>
    %92 = arith.truncf %89 : vector<8x8xf32> to vector<8x8xbf16>
    %93 = vector.extract_strided_slice %16 {offsets = [0, 24], sizes = [8, 8], strides = [1, 1]} : vector<8x32xbf16> to vector<8x8xbf16>
    %cst_37 = arith.constant dense<0.000000e+00> : vector<8x8xf32>
    %94 = tpu.matmul %92, %93, %cst_37 {dimension_numbers = #tpu.dot_dimension_numbers<[1], [0], [0], [1], [0, 0, 1, 1], [], []>} : vector<8x8xbf16>, vector<8x8xbf16>, vector<8x8xf32> -> vector<8x8xf32>
    %95 = vector.broadcast %91 : vector<8x1xf32> to vector<8x8xf32>
    %96 = arith.divf %94, %95 : vector<8x8xf32>
    %97 = tpu.concatenate %36, %56, %76, %96 in 1 : vector<8x8xf32>, vector<8x8xf32>, vector<8x8xf32>, vector<8x8xf32> -> vector<8x32xf32>
    %98 = arith.truncf %97 : vector<8x32xf32> to vector<8x32xbf16>
    %cst_38 = arith.constant dense<0.000000e+00> : vector<8x32xf32>
    %99 = tpu.matmul %98, %10, %cst_38 {dimension_numbers = #tpu.dot_dimension_numbers<[1], [0], [0], [1], [0, 0, 1, 1], [], []>} : vector<8x32xbf16>, vector<32x32xbf16>, vector<8x32xf32> -> vector<8x32xf32>
    %100 = vector.broadcast %11 : vector<1x32xf32> to vector<8x32xf32>
    %101 = arith.addf %99, %100 : vector<8x32xf32>
    %102 = arith.addf %101, %9 : vector<8x32xf32>
    %cst_39 = arith.constant dense<0.000000e+00> : vector<8xf32>
    %103 = vector.multi_reduction <add>, %102, %cst_39 [1] : vector<8x32xf32> to vector<8xf32>
    %104 = vector.shape_cast %103 : vector<8xf32> to vector<8x1xf32>
    %cst_40 = arith.constant 3.200000e+01 : f32
    %105 = vector.broadcast %cst_40 : f32 to vector<8x1xf32>
    %106 = arith.divf %104, %105 : vector<8x1xf32>
    %107 = vector.broadcast %106 : vector<8x1xf32> to vector<8x32xf32>
    %108 = arith.subf %102, %107 : vector<8x32xf32>
    %109 = arith.mulf %108, %108 : vector<8x32xf32>
    %cst_41 = arith.constant dense<0.000000e+00> : vector<8xf32>
    %110 = vector.multi_reduction <add>, %109, %cst_41 [1] : vector<8x32xf32> to vector<8xf32>
    %111 = vector.shape_cast %110 : vector<8xf32> to vector<8x1xf32>
    %cst_42 = arith.constant 3.200000e+01 : f32
    %112 = vector.broadcast %cst_42 : f32 to vector<8x1xf32>
    %113 = arith.divf %111, %112 : vector<8x1xf32>
    %cst_43 = arith.constant 9.99999974E-6 : f32
    %114 = vector.broadcast %cst_43 : f32 to vector<8x1xf32>
    %115 = arith.addf %113, %114 : vector<8x1xf32>
    %116 = math.rsqrt %115 : vector<8x1xf32>
    %117 = vector.broadcast %116 : vector<8x1xf32> to vector<8x32xf32>
    %118 = arith.mulf %108, %117 : vector<8x32xf32>
    %119 = vector.broadcast %12 : vector<1x32xf32> to vector<8x32xf32>
    %120 = arith.mulf %118, %119 : vector<8x32xf32>
    %121 = vector.broadcast %13 : vector<1x32xf32> to vector<8x32xf32>
    %122 = arith.addf %120, %121 : vector<8x32xf32>
    %123 = vector.shape_cast %122 : vector<8x32xf32> to vector<1x8x32xf32>
    %c0_44 = arith.constant 0 : index
    %c0_45 = arith.constant 0 : index
    %c0_46 = arith.constant 0 : index
    %124 = vector.load %arg9[%c0_44, %c0_45, %c0_46] : memref<1x8x32xf32, #tpu.memory_space<vmem>>, vector<1x8x32xf32>
    tpu.vector_store %arg9[%c0_44, %c0_45, %c0_46], %123 {strides = array<i32>} : memref<1x8x32xf32, #tpu.memory_space<vmem>>, vector<1x8x32xf32>,
    return
  }
  func.func @transform_0(%arg0: i32) -> (i32, i32, i32) {
    %c0_i32 = arith.constant 0 : i32
    %c0_i32_0 = arith.constant 0 : i32
    %c0_i32_1 = arith.constant 0 : i32
    return %arg0, %c0_i32, %c0_i32_0 : i32, i32, i32
  }
  func.func @transform_1(%arg0: i32) -> (i32, i32, i32) {
    %c0_i32 = arith.constant 0 : i32
    %c0_i32_0 = arith.constant 0 : i32
    %c0_i32_1 = arith.constant 0 : i32
    return %arg0, %c0_i32, %c0_i32_0 : i32, i32, i32
  }
  func.func @transform_2(%arg0: i32) -> (i32, i32, i32) {
    %c0_i32 = arith.constant 0 : i32
    %c0_i32_0 = arith.constant 0 : i32
    %c0_i32_1 = arith.constant 0 : i32
    return %arg0, %c0_i32, %c0_i32_0 : i32, i32, i32
  }
  func.func @transform_3(%arg0: i32) -> (i32, i32, i32) {
    %c0_i32 = arith.constant 0 : i32
    %c0_i32_0 = arith.constant 0 : i32
    %c0_i32_1 = arith.constant 0 : i32
    return %arg0, %c0_i32, %c0_i32_0 : i32, i32, i32
  }
  func.func @transform_4(%arg0: i32) -> (i32, i32) {
    %c0_i32 = arith.constant 0 : i32
    %c0_i32_0 = arith.constant 0 : i32
    %c0_i32_1 = arith.constant 0 : i32
    return %c0_i32, %c0_i32_0 : i32, i32
  }
  func.func @transform_5(%arg0: i32) -> (i32, i32) {
    %c0_i32 = arith.constant 0 : i32
    %c0_i32_0 = arith.constant 0 : i32
    %c0_i32_1 = arith.constant 0 : i32
    return %c0_i32, %c0_i32_0 : i32, i32
  }
  func.func @transform_6(%arg0: i32) -> (i32, i32) {
    %c0_i32 = arith.constant 0 : i32
    %c0_i32_0 = arith.constant 0 : i32
    %c0_i32_1 = arith.constant 0 : i32
    return %c0_i32, %c0_i32_0 : i32, i32
  }
  func.func @transform_7(%arg0: i32) -> (i32, i32) {
    %c0_i32 = arith.constant 0 : i32
    %c0_i32_0 = arith.constant 0 : i32
    %c0_i32_1 = arith.constant 0 : i32
    return %c0_i32, %c0_i32_0 : i32, i32
  }
  func.func @transform_8(%arg0: i32) -> (i32, i32, i32) {
    %c0_i32 = arith.constant 0 : i32
    %c0_i32_0 = arith.constant 0 : i32
    %c0_i32_1 = arith.constant 0 : i32
    return %arg0, %c0_i32, %c0_i32_0 : i32, i32, i32
  }
}

module attributes {stable_mosaic.version = 11 : i64} {
  func.func @_ln_kernel(%arg0: i32, %arg1: memref<16x32xf32, #tpu.memory_space<vmem>>, %arg2: memref<1x32xf32, #tpu.memory_space<vmem>>, %arg3: memref<1x32xf32, #tpu.memory_space<vmem>>, %arg4: memref<16x32xf32, #tpu.memory_space<vmem>>) attributes {dimension_semantics = [#tpu.dimension_semantics<parallel>], iteration_bounds = array<i64: 1>, scalar_prefetch = 0 : i64, scratch_operands = 0 : i64, tpu.core_type = #tpu.core_type<tc>, window_params = [{transform_indices = @transform_0, window_bounds = array<i64: 16, 32>}, {pipeline_mode = #tpu.pipeline_mode<synchronous>, transform_indices = @transform_1, window_bounds = array<i64: 1, 32>}, {pipeline_mode = #tpu.pipeline_mode<synchronous>, transform_indices = @transform_2, window_bounds = array<i64: 1, 32>}, {transform_indices = @transform_3, window_bounds = array<i64: 16, 32>}]} {
    %c0 = arith.constant 0 : index
    %c0_0 = arith.constant 0 : index
    %0 = vector.load %arg1[%c0, %c0_0] : memref<16x32xf32, #tpu.memory_space<vmem>>, vector<16x32xf32>
    %c0_1 = arith.constant 0 : index
    %c0_2 = arith.constant 0 : index
    %1 = vector.load %arg2[%c0_1, %c0_2] : memref<1x32xf32, #tpu.memory_space<vmem>>, vector<1x32xf32>
    %c0_3 = arith.constant 0 : index
    %c0_4 = arith.constant 0 : index
    %2 = vector.load %arg3[%c0_3, %c0_4] : memref<1x32xf32, #tpu.memory_space<vmem>>, vector<1x32xf32>
    %cst = arith.constant dense<0.000000e+00> : vector<16xf32>
    %3 = vector.multi_reduction <add>, %0, %cst [1] : vector<16x32xf32> to vector<16xf32>
    %4 = vector.shape_cast %3 : vector<16xf32> to vector<16x1xf32>
    %cst_5 = arith.constant 3.200000e+01 : f32
    %5 = vector.broadcast %cst_5 : f32 to vector<16x1xf32>
    %6 = arith.divf %4, %5 : vector<16x1xf32>
    %7 = vector.broadcast %6 : vector<16x1xf32> to vector<16x32xf32>
    %8 = arith.subf %0, %7 : vector<16x32xf32>
    %9 = arith.mulf %8, %8 : vector<16x32xf32>
    %cst_6 = arith.constant dense<0.000000e+00> : vector<16xf32>
    %10 = vector.multi_reduction <add>, %9, %cst_6 [1] : vector<16x32xf32> to vector<16xf32>
    %11 = vector.shape_cast %10 : vector<16xf32> to vector<16x1xf32>
    %cst_7 = arith.constant 3.200000e+01 : f32
    %12 = vector.broadcast %cst_7 : f32 to vector<16x1xf32>
    %13 = arith.divf %11, %12 : vector<16x1xf32>
    %cst_8 = arith.constant 9.99999974E-6 : f32
    %14 = vector.broadcast %cst_8 : f32 to vector<16x1xf32>
    %15 = arith.addf %13, %14 : vector<16x1xf32>
    %16 = math.rsqrt %15 : vector<16x1xf32>
    %17 = vector.broadcast %16 : vector<16x1xf32> to vector<16x32xf32>
    %18 = arith.mulf %8, %17 : vector<16x32xf32>
    %19 = vector.broadcast %1 : vector<1x32xf32> to vector<16x32xf32>
    %20 = arith.mulf %18, %19 : vector<16x32xf32>
    %21 = vector.broadcast %2 : vector<1x32xf32> to vector<16x32xf32>
    %22 = arith.addf %20, %21 : vector<16x32xf32>
    %c0_9 = arith.constant 0 : index
    %c0_10 = arith.constant 0 : index
    %23 = vector.load %arg4[%c0_9, %c0_10] : memref<16x32xf32, #tpu.memory_space<vmem>>, vector<16x32xf32>
    tpu.vector_store %arg4[%c0_9, %c0_10], %22 {strides = array<i32>} : memref<16x32xf32, #tpu.memory_space<vmem>>, vector<16x32xf32>,
    return
  }
  func.func @transform_0(%arg0: i32) -> (i32, i32) {
    %c0_i32 = arith.constant 0 : i32
    %c0_i32_0 = arith.constant 0 : i32
    return %arg0, %c0_i32 : i32, i32
  }
  func.func @transform_1(%arg0: i32) -> (i32, i32) {
    %c0_i32 = arith.constant 0 : i32
    %c0_i32_0 = arith.constant 0 : i32
    %c0_i32_1 = arith.constant 0 : i32
    return %c0_i32, %c0_i32_0 : i32, i32
  }
  func.func @transform_2(%arg0: i32) -> (i32, i32) {
    %c0_i32 = arith.constant 0 : i32
    %c0_i32_0 = arith.constant 0 : i32
    %c0_i32_1 = arith.constant 0 : i32
    return %c0_i32, %c0_i32_0 : i32, i32
  }
  func.func @transform_3(%arg0: i32) -> (i32, i32) {
    %c0_i32 = arith.constant 0 : i32
    %c0_i32_0 = arith.constant 0 : i32
    return %arg0, %c0_i32 : i32, i32
  }
}

module attributes {stable_mosaic.version = 11 : i64} {
  func.func @_linear_kernel(%arg0: i32, %arg1: i32, %arg2: i32, %arg3: memref<16x32xf32, #tpu.memory_space<vmem>>, %arg4: memref<32x16xbf16, #tpu.memory_space<vmem>>, %arg5: memref<1x16xf32, #tpu.memory_space<vmem>>, %arg6: memref<16x16xf32, #tpu.memory_space<vmem>>, %arg7: memref<16x16xf32, #tpu.memory_space<vmem>>) attributes {dimension_semantics = [#tpu.dimension_semantics<parallel>, #tpu.dimension_semantics<parallel>, #tpu.dimension_semantics<arbitrary>], iteration_bounds = array<i64: 1, 1, 1>, scalar_prefetch = 0 : i64, scratch_operands = 1 : i64, tpu.core_type = #tpu.core_type<tc>, window_params = [{transform_indices = @transform_0, window_bounds = array<i64: 16, 32>}, {transform_indices = @transform_1, window_bounds = array<i64: 32, 16>}, {transform_indices = @transform_2, window_bounds = array<i64: 1, 16>}, {transform_indices = @transform_3, window_bounds = array<i64: 16, 16>}]} {
    %c0_i32 = arith.constant 0 : i32
    %0 = arith.cmpi eq, %arg2, %c0_i32 : i32
    %1 = arith.extui %0 : i1 to i32
    %c0_i32_0 = arith.constant 0 : i32
    %2 = arith.cmpi ne, %1, %c0_i32_0 : i32
    scf.if %2 {
      %cst_10 = arith.constant 0.000000e+00 : f32
      %13 = vector.broadcast %cst_10 : f32 to vector<16x16xf32>
      %c0_11 = arith.constant 0 : index
      %c0_12 = arith.constant 0 : index
      %14 = vector.load %arg7[%c0_11, %c0_12] : memref<16x16xf32, #tpu.memory_space<vmem>>, vector<16x16xf32>
      tpu.vector_store %arg7[%c0_11, %c0_12], %13 {strides = array<i32>} : memref<16x16xf32, #tpu.memory_space<vmem>>, vector<16x16xf32>,
    } else {
    }
    %c0 = arith.constant 0 : index
    %c0_1 = arith.constant 0 : index
    %3 = vector.load %arg7[%c0, %c0_1] : memref<16x16xf32, #tpu.memory_space<vmem>>, vector<16x16xf32>
    %c0_2 = arith.constant 0 : index
    %c0_3 = arith.constant 0 : index
    %4 = vector.load %arg3[%c0_2, %c0_3] : memref<16x32xf32, #tpu.memory_space<vmem>>, vector<16x32xf32>
    %5 = arith.truncf %4 : vector<16x32xf32> to vector<16x32xbf16>
    %c0_4 = arith.constant 0 : index
    %c0_5 = arith.constant 0 : index
    %6 = vector.load %arg4[%c0_4, %c0_5] : memref<32x16xbf16, #tpu.memory_space<vmem>>, vector<32x16xbf16>
    %cst = arith.constant dense<0.000000e+00> : vector<16x16xf32>
    %7 = tpu.matmul %5, %6, %cst {dimension_numbers = #tpu.dot_dimension_numbers<[1], [0], [0], [1], [0, 0, 1, 1], [], []>} : vector<16x32xbf16>, vector<32x16xbf16>, vector<16x16xf32> -> vector<16x16xf32>
    %8 = arith.addf %3, %7 : vector<16x16xf32>
    %c0_6 = arith.constant 0 : index
    %c0_7 = arith.constant 0 : index
    %9 = vector.load %arg7[%c0_6, %c0_7] : memref<16x16xf32, #tpu.memory_space<vmem>>, vector<16x16xf32>
    tpu.vector_store %arg7[%c0_6, %c0_7], %8 {strides = array<i32>} : memref<16x16xf32, #tpu.memory_space<vmem>>, vector<16x16xf32>,
    %c0_i32_8 = arith.constant 0 : i32
    %10 = arith.cmpi eq, %arg2, %c0_i32_8 : i32
    %11 = arith.extui %10 : i1 to i32
    %c0_i32_9 = arith.constant 0 : i32
    %12 = arith.cmpi ne, %11, %c0_i32_9 : i32
    scf.if %12 {
      %c0_10 = arith.constant 0 : index
      %c0_11 = arith.constant 0 : index
      %13 = vector.load %arg7[%c0_10, %c0_11] : memref<16x16xf32, #tpu.memory_space<vmem>>, vector<16x16xf32>
      %c0_12 = arith.constant 0 : index
      %c0_13 = arith.constant 0 : index
      %14 = vector.load %arg5[%c0_12, %c0_13] : memref<1x16xf32, #tpu.memory_space<vmem>>, vector<1x16xf32>
      %15 = vector.broadcast %14 : vector<1x16xf32> to vector<16x16xf32>
      %16 = arith.addf %13, %15 : vector<16x16xf32>
      %c0_14 = arith.constant 0 : index
      %c0_15 = arith.constant 0 : index
      %17 = vector.load %arg6[%c0_14, %c0_15] : memref<16x16xf32, #tpu.memory_space<vmem>>, vector<16x16xf32>
      tpu.vector_store %arg6[%c0_14, %c0_15], %16 {strides = array<i32>} : memref<16x16xf32, #tpu.memory_space<vmem>>, vector<16x16xf32>,
    } else {
    }
    return
  }
  func.func @transform_0(%arg0: i32, %arg1: i32, %arg2: i32) -> (i32, i32) {
    %c0_i32 = arith.constant 0 : i32
    return %arg0, %arg2 : i32, i32
  }
  func.func @transform_1(%arg0: i32, %arg1: i32, %arg2: i32) -> (i32, i32) {
    %c0_i32 = arith.constant 0 : i32
    return %arg2, %arg1 : i32, i32
  }
  func.func @transform_2(%arg0: i32, %arg1: i32, %arg2: i32) -> (i32, i32) {
    %c0_i32 = arith.constant 0 : i32
    %c0_i32_0 = arith.constant 0 : i32
    return %c0_i32, %arg1 : i32, i32
  }
  func.func @transform_3(%arg0: i32, %arg1: i32, %arg2: i32) -> (i32, i32) {
    %c0_i32 = arith.constant 0 : i32
    return %arg0, %arg1 : i32, i32
  }
}

</mosaic_0001>

<bundles_post_ra>
// kernel: decoder_forward.14
= control target key start
LH: loop header
LB: loop body
LE: loop exit
PB: predicated region body
PF: predicated region fallthrough
CT: control target
= control target key end

     0   :  { %vm19_vm0 = vcmask 785408   ;;  %v132_v0 = vmov 0.0   ;;  %vm133_vm1 = vmmov 0   ;;  %vm43_vm2 = vcmask 261120   ;;  %s181_s1 = inlined_call_operand.vmem [shape: bf16[32,96], index: 1, kind: input, shape index: {}]   ;;  %s182_s0 = inlined_call_operand.vmem [shape: f32[16,32], index: 0, kind: input, shape index: {}]   ;;  %s183_s2 = inlined_call_operand.vmem [shape: f32[1,96], index: 2, kind: input, shape index: {}]   ;;  %s184_s3 = inlined_call_operand.vmem [shape: f32[16,96], index: 3, kind: output, shape index: {}]  }
   0x1   :  { %120 = vmatprep.subr.bf16.mxu0 %v132_v0  ;;  %v130_v1 = vld [vmem:[%s181_s1 + $0x8] sm:$0xff]   ;;  %124 = vmatprep.mubr.msk.bf16.mxu0 %vm133_vm1, %v132_v0  ;;  %20 = vst.msk [vmem:[#allocation2] sm:$0xff] %vm19_vm0, %v132_v0  ;;  %21 = vst.msk [vmem:[#allocation2 + $0x8] sm:$0xff] %vm19_vm0, %v132_v0  ;;  %v131_v2 = vld [vmem:[%s181_s1] sm:$0xff]  }
   0x2   :  { %121 = vmatpush3.bf16.msra.mxu0 %v130_v1  ;;  %v24_v3 = vld [vmem:[%s182_s0] sm:$0xff]  ;;  %v25_v4 = vld [vmem:[%s182_s0 + $0x8] sm:$0xff] }
   0x3   :  { %122 = vmatprep.subr.bf16.mxu0 %v132_v0  ;;  %v26_v5 = vpack.c.bf16 %v25_v4, %v24_v3  ;;  %v116_v14 = vld [vmem:[%s183_s2] ss:$0 sm:$0xff] }
   0x6   :  { %123 = vmatpush3.bf16.msra.mxu0 %v131_v2 }
   0x8   :  { %v22_v6 = vld [vmem:[#allocation2] sm:$0xff]  ;;  %v23_v10 = vld [vmem:[#allocation2 + $0x8] sm:$0xff] }
   0x9   :  { %125 = vmatmul.mubr.msk.bf16.vlgmr.msra.gmra.mxu0 %vm43_vm2, %v26_v5 }
  0xc9   :  { %v81_v7 = vpop.f32.mrf.mxu0 }
  0xca   :  { %v88_v8 = vadd.f32 %v81_v7, %v22_v6 }
  0xcb   :  { %v126_v9 = vpop.f32.mrf.mxu0 }
  0xcc   :  { %91 = vst.msk [vmem:[#allocation2] sm:$0xff] %vm19_vm0, %v88_v8 }
  0xcd   :  { %v84_v11 = vpop.f32.mrf.mxu0 }
  0xce   :  { %v89_v12 = vadd.f32 %v84_v11, %v23_v10 }
  0xcf   :  { %v127_v13 = vpop.f32.mrf.mxu0 }
  0xd0   :  { %92 = vst.msk [vmem:[#allocation2 + $0x8] sm:$0xff] %vm19_vm0, %v89_v12 }
  0xd3   :  { %v96_v15 = vld [vmem:[#allocation2] sm:$0xff] }
  0xd4   :  { %v105_v16 = vadd.f32 %v116_v14, %v96_v15 }
  0xd6   :  { %107 = vst.msk [vmem:[%s184_s3] sm:$0xff] %vm19_vm0, %v105_v16 }
  0xd7   :  { %v97_v17 = vld [vmem:[#allocation2 + $0x8] sm:$0xff] }
  0xd8   :  { %v106_v18 = vadd.f32 %v116_v14, %v97_v17 }
  0xda   :  { %108 = vst.msk [vmem:[%s184_s3 + $0x8] sm:$0xff] %vm19_vm0, %v106_v18 }

// kernel: decoder_forward.15
= control target key start
LH: loop header
LB: loop body
LE: loop exit
PB: predicated region body
PF: predicated region fallthrough
CT: control target
= control target key end

     0   :  { %s1170_s24 = smov 0   ;;  %s1302_s0 = inlined_call_operand.vmem [shape: f32[2,8,96], index: 0, kind: input, shape index: {}]   ;;  %s1303_s1 = inlined_call_operand.vmem [shape: f32[2,8,32], index: 1, kind: input, shape index: {}]   ;;  %s1304_s2 = inlined_call_operand.vmem [shape: f32[2,1,8], index: 2, kind: input, shape index: {}]   ;;  %s1305_s3 = inlined_call_operand.vmem [shape: bf16[32,32], index: 3, kind: input, shape index: {}]   ;;  %s1306_s4 = inlined_call_operand.vmem [shape: f32[1,32], index: 4, kind: input, shape index: {}]   ;;  %s1307_s5 = inlined_call_operand.vmem [shape: f32[1,32], index: 5, kind: input, shape index: {}]   ;;  %s1308_s6 = inlined_call_operand.vmem [shape: f32[1,32], index: 6, kind: input, shape index: {}]   ;;  %s1309_s7 = inlined_call_operand.vmem [shape: f32[2,8,32], index: 7, kind: output, shape index: {}]  }
   0x1 LB: > { %s962_s25 = sadd.s32 4294967295, %s1112_s24   ;;  %p966_p0 = scmp.ge.s32.totalorder %s1112_s24, 1  ;;  %s1112_s24 = sphi %s1170_s24, %s17_s24  }
   0x2   : > { %p253_p1 = scmp.lt.s32.totalorder %s1112_s24, 3 }
   0x4   : > { %p254_p2 = pnand %p966_p0, %p253_p1 }
   0x5   : > { %p290_p3 = scmp.lt.s32.totalorder (!%p254_p2), %s962_s25, 1  ;;  %s1116_s30 = smov (!%p254_p2), 96  }
   0x6   : > { %257 = sbr.rel (%p254_p2) target bundleno = 1740 (0x6cc), region = 48  ;;  %s1117_s8 = smov (!%p254_p2), 64  }
   0x7   : > { %s1118_s9 = smov (!%p254_p2), 88   ;;  %s1119_s10 = smov (!%p254_p2), 120  }
   0x8   : > { %s1120_s11 = smov (!%p254_p2), 80   ;;  %s1121_s12 = smov (!%p254_p2), 112  }
   0x9   : > { %s1122_s13 = smov (!%p254_p2), 72   ;;  %s1123_s14 = smov (!%p254_p2), 104  }
   0xa   : > { %s1124_s18 = smov (!%p254_p2), 48   ;;  %s1125_s19 = smov (!%p254_p2), 56  }
   0xb   : > { %v1114_v0 = vmov 0.0   ;;  %vm1115_vm0 = vmmov 0   ;;  %s1311_s25 = smov (!%p290_p3, %s962_s25), 1  ;;  %vm332_vm1 = vcmask 64512   ;;  %v316_v5 = vlaneseq  ;;  %s1126_s20 = smov 40  }
   0xc   : > { %1006 = vmatprep.subr.bf16.mxu0 %v1114_v0  ;;  %1008 = vmatprep.mubr.msk.bf16.mxu0 %vm1115_vm0, %v1114_v0  ;;  %s1187_s26 = sshll.u32 %s1311_s25, 3  ;;  %s300_s17 = scalar_lea.vmem %s1304_s2, %s1311_s25  ;;  %vm396_vm3 = vcmask 1043456   ;;  %vm791_vm4 = vcmask 130048   ;;  %vm793_vm5 = vcmask 195584   ;;  %vm814_vm6 = vcmask 261120  }
   0xd   : > { %1012 = vmatprep.subr.bf16.mxu1 %v1114_v0  ;;  %1014 = vmatprep.mubr.msk.bf16.mxu1 %vm1115_vm0, %v1114_v0  ;;  %s293_s29 = scalar_lea.vmem %s1302_s0, %s1187_s26  ;;  %v317_v6 = vshrl.u32 %v316_v5, 7  ;;  %v319_v7 = vand.u32 127, %v316_v5  ;;  %v970_v8 = vld [vmem:[%s300_s17] ss:$0 sm:$0xff]  ;;  %s1127_s27 = smov 8  }
   0xe   : > { %v306_v1 = vld [vmem:[%s293_s29] sm:$0xff]  ;;  %s1128_s28 = smov 16   ;;  %s1129_s29 = smov 24  }
   0xf   : > { %v1193_v2 = vpack.c.bf16 %v306_v1, %v306_v1  ;;  %vm320_vm2 = vcmp.le.s32.totalorder %v319_v7, %v317_v6 }
  0x10   : > { %v1213_v10 = vsel %vm320_vm2, %v970_v8, -1e+30 }
  0x11   : > { %330 = vrot.lane.b32.xlu0 %v1193_v2, %s1116_s30  ;;  %391 = vrot.lane.b32.xlu1 %v1193_v2, %s1117_s8 }
  0x15   : > { %444 = vrot.lane.b32.xlu1 %v1193_v2, %s1118_s9  ;;  %s297_s9 = scalar_lea.vmem %s1303_s1, %s1187_s26 }
  0x19   : > { %442 = vrot.lane.b32.xlu1 %v1193_v2, %s1119_s10 }
  0x1d   : > { %556 = vrot.lane.b32.xlu1 %v1193_v2, %s1120_s11 }
  0x21   : > { %554 = vrot.lane.b32.xlu1 %v1193_v2, %s1121_s12 }
  0x25   : > { %668 = vrot.lane.b32.xlu1 %v1193_v2, %s1122_s13 }
  0x29   : > { %666 = vrot.lane.b32.xlu1 %v1193_v2, %s1123_s14 }
  0x83   : > { %v331_v3 = vpop.permute.xlu0 %330  ;;  %v392_v17 = vpop.permute.xlu1 %391 }
  0x84   : > { %v337_v4 = vsel %vm332_vm1, %v331_v3, 0  ;;  %v398_v18 = vsel %vm396_vm3, %v392_v17, 0 }
  0x85   : > { %1007 = vmatpush3.bf16.xpose.msra.mxu0 %v337_v4  ;;  %1013 = vmatpush3.bf16.msra.mxu1 %v398_v18 }
  0x86   : > { %1024 = vmatprep.subr.bf16.mxu0 %v1114_v0  ;;  %1018 = vmatprep.subr.bf16.mxu1 %v1114_v0 }
  0x87   : > { %v445_v22 = vpop.permute.xlu1 %444 }
  0x88   : > { %v450_v25 = vsel %vm332_vm1, %v445_v22, 0  ;;  %v1086_v22 = vld [vmem:[%s1305_s3 + $0x8] sm:$0xff]  }
  0x8b   : > { %v443_v24 = vpop.permute.xlu1 %442 }
  0x8c   : > { %1009 = vmatmul.mubr.msk.bf16.vlgmr.msra.gmra.mxu0 %vm332_vm1, %v1193_v2 }
  0x8d   : > { %1026 = vmatprep.mubr.msk.bf16.mxu0 %vm1115_vm0, %v1114_v0 }
  0x8f   : > { %v557_v27 = vpop.permute.xlu1 %556 }
  0x90   : > { %v562_v28 = vsel %vm332_vm1, %v557_v27, 0 }
  0x93   : > { %v555_v29 = vpop.permute.xlu1 %554 }
  0x97   : > { %v669_v30 = vpop.permute.xlu1 %668 }
  0x98   : > { %v674_v31 = vsel %vm332_vm1, %v669_v30, 0 }
  0x9b   : > { %v667_v32 = vpop.permute.xlu1 %666 }
 0x14c   : > { %v373_v9 = vpop.f32.mrf.mxu0 }
 0x14d   : > { %v379_v11 = vmul.f32 0.35355338, %v373_v9 }
 0x14e   : > { %v1010_v12 = vpop.f32.mrf.mxu0 }
 0x14f   : > { %v380_v13 = vadd.f32 %v379_v11, %v1213_v10 }
 0x150   : > { %v376_v14 = vpop.f32.mrf.mxu0 }
 0x151   : > { %v381_v15 = vsel %vm332_vm1, %v380_v13, -inf }
 0x152   : > { %382 = vmax.xlane.f32.xlu0 %v381_v15  ;;  %v1011_v16 = vpop.f32.mrf.mxu0 }
 0x1db   : > { %v383_v19 = vpop.xlane.xlu0 %382 }
 0x1dc   : > { %v384_v20 = vsub.f32 %v380_v13, %v383_v19 }
 0x1de   : > { %v385_v21 = vmul.f32 1.442695, %v384_v20 }
 0x1e0   : > { %1088 = vpow2.f32 %v385_v21 }
 0x1ed   : > { %v1219_v23 = vpop.eup %1088 }
 0x1ee   : > { %v390_v26 = vpack.c.bf16 %v1219_v23, %v1219_v23  ;;  %v387_v19 = vsel %vm332_vm1, %v1219_v23, 0.0 }
 0x1f0   : > { %1015 = vmatmul.mubr.msk.bf16.vlgmr.msra.gmra.mxu1 %vm332_vm1, %v390_v26  ;;  %v1087_v26 = vld [vmem:[%s1305_s3] sm:$0xff]  }
 0x1f1   : > { %1019 = vmatpush3.bf16.xpose.msra.mxu1 %v450_v25  ;;  %1020 = vmatprep.mubr.msk.bf16.mxu1 %vm1115_vm0, %v1114_v0 }
 0x1f2   : > { %1030 = vmatprep.subr.bf16.mxu1 %v1114_v0 }
 0x1f8   : > { %1021 = vmatmul.mubr.msk.bf16.vlgmr.msra.gmra.mxu1 %vm332_vm1, %v443_v24 }
 0x1f9   : > { %1031 = vmatpush3.bf16.xpose.msra.mxu1 %v562_v28  ;;  %1032 = vmatprep.mubr.msk.bf16.mxu1 %vm1115_vm0, %v1114_v0 }
 0x1fa   : > { %1042 = vmatprep.subr.bf16.mxu1 %v1114_v0 }
 0x200   : > { %1033 = vmatmul.mubr.msk.bf16.vlgmr.msra.gmra.mxu1 %vm332_vm1, %v555_v29 }
 0x201   : > { %1043 = vmatpush3.bf16.xpose.msra.mxu1 %v674_v31  ;;  %1044 = vmatprep.mubr.msk.bf16.mxu1 %vm1115_vm0, %v1114_v0 }
 0x202   : > { %1054 = vmatprep.subr.bf16.mxu1 %v1114_v0 }
 0x208   : > { %1045 = vmatmul.mubr.msk.bf16.vlgmr.msra.gmra.mxu1 %vm332_vm1, %v667_v32 }
 0x209   : > { %1058 = vmatprep.mubr.msk.bf16.mxu1 %vm1115_vm0, %v1114_v0  ;;  %1055 = vmatpush3.bf16.msra.mxu1 %v1086_v22 }
 0x20a   : > { %1056 = vmatprep.subr.bf16.mxu1 %v1114_v0 }
 0x20d   : > { %1057 = vmatpush3.bf16.msra.mxu1 %v1087_v26 }
 0x2b0   : > { %v1241_v33 = vpop.f32.mrf.mxu1 }
 0x2b2   : > { %v1016_v34 = vpop.f32.mrf.mxu1 }
 0x2b4   : > { %v437_v35 = vpop.f32.mrf.mxu1 }
 0x2b6   : > { %v1017_v36 = vpop.f32.mrf.mxu1 }
 0x2b8   : > { %v486_v37 = vpop.f32.mrf.mxu1 }
 0x2b9   : > { %v492_v38 = vmul.f32 0.35355338, %v486_v37 }
 0x2ba   : > { %v1022_v39 = vpop.f32.mrf.mxu1 }
 0x2bb   : > { %v493_v40 = vadd.f32 %v492_v38, %v1213_v10 }
 0x2bc   : > { %v489_v41 = vpop.f32.mrf.mxu1 }
 0x2bd   : > { %v494_v42 = vsel %vm332_vm1, %v493_v40, -inf }
 0x2be   : > { %495 = vmax.xlane.f32.xlu1 %v494_v42  ;;  %v1023_v43 = vpop.f32.mrf.mxu1 }
 0x2c0   : > { %v598_v44 = vpop.f32.mrf.mxu1 }
 0x2c1   : > { %v604_v45 = vmul.f32 0.35355338, %v598_v44 }
 0x2c2   : > { %v1034_v46 = vpop.f32.mrf.mxu1 }
 0x2c3   : > { %v605_v47 = vadd.f32 %v604_v45, %v1213_v10 }
 0x2c4   : > { %v601_v48 = vpop.f32.mrf.mxu1 }
 0x2c5   : > { %v606_v49 = vsel %vm332_vm1, %v605_v47, -inf }
 0x2c6   : > { %607 = vmax.xlane.f32.xlu0 %v606_v49  ;;  %v1035_v50 = vpop.f32.mrf.mxu1 }
 0x2c8   : > { %v710_v51 = vpop.f32.mrf.mxu1 }
 0x2c9   : > { %v716_v55 = vmul.f32 0.35355338, %v710_v51 }
 0x2ca   : > { %v1046_v52 = vpop.f32.mrf.mxu1 }
 0x2cb   : > { %v717_v56 = vadd.f32 %v716_v55, %v1213_v10 }
 0x2cc   : > { %v713_v53 = vpop.f32.mrf.mxu1 }
 0x2cd   : > { %v718_v57 = vsel %vm332_vm1, %v717_v56, -inf }
 0x2ce   : > { %v1047_v54 = vpop.f32.mrf.mxu1 }
 0x2cf   : > { %616 = vrot.lane.b32.xlu1 %v1193_v2, %s1124_s18  ;;  %v308_v54 = vld [vmem:[%s297_s9] sm:$0xff]  ;;  %s304_s18 = scalar_lea.vmem %s1309_s7, %s1187_s26 }
 0x2dc   : > { %504 = vrot.lane.b32.xlu0 %v1193_v2, %s1125_s19 }
 0x2fb   : > { %719 = vmax.xlane.f32.xlu0 %v718_v57 }
 0x311   : > { %728 = vrot.lane.b32.xlu0 %v1193_v2, %s1126_s20 }
 0x347   : > { %v496_v58 = vpop.xlane.xlu1 %495 }
 0x348   : > { %v497_v59 = vsub.f32 %v493_v40, %v496_v58 }
 0x34a   : > { %v498_v60 = vmul.f32 1.442695, %v497_v59 }
 0x34b   : > { %v617_v4 = vpop.permute.xlu1 %616 }
 0x34c   : > { %1090 = vpow2.f32 %v498_v60  ;;  %v622_v2 = vsel %vm396_vm3, %v617_v4, 0 }
 0x34f   : > { %v608_v61 = vpop.xlane.xlu0 %607 }
 0x350   : > { %v609_v62 = vsub.f32 %v605_v47, %v608_v61 }
 0x352   : > { %v610_v63 = vmul.f32 1.442695, %v609_v62 }
 0x353   : > { %v505_v1 = vpop.permute.xlu0 %504 }
 0x354   : > { %1092 = vpow2.f32 %v610_v63  ;;  %v510_v3 = vsel %vm396_vm3, %v505_v1, 0 }
 0x355   : > { %1025 = vmatpush3.bf16.msra.mxu0 %v510_v3 }
 0x356   : > { %1036 = vmatprep.subr.bf16.mxu0 %v1114_v0 }
 0x359   : > { %v1091_v5 = vpop.eup %1090 }
 0x35a   : > { %v500_v6 = vsel %vm332_vm1, %v1091_v5, 0.0  ;;  %v503_v7 = vpack.c.bf16 %v1091_v5, %v1091_v5 }
 0x35b   : > { %501 = vadd.xlane.f32.xlu0 %v500_v6 }
 0x35c   : > { %1027 = vmatmul.mubr.msk.bf16.vlgmr.msra.gmra.mxu0 %vm332_vm1, %v503_v7 }
 0x35d   : > { %1037 = vmatpush3.bf16.msra.mxu0 %v622_v2  ;;  %1038 = vmatprep.mubr.msk.bf16.mxu0 %vm1115_vm0, %v1114_v0  ;;  %v983_v2 = vld [vmem:[%s1307_s5] ss:$0 sm:$0xff] }
 0x35e   : > { %1048 = vmatprep.subr.bf16.mxu0 %v1114_v0 }
 0x361   : > { %v1093_v8 = vpop.eup %1092 }
 0x362   : > { %v612_v9 = vsel %vm332_vm1, %v1093_v8, 0.0  ;;  %v615_v10 = vpack.c.bf16 %v1093_v8, %v1093_v8 }
 0x363   : > { %613 = vadd.xlane.f32.xlu1 %v612_v9  ;;  %v984_v9 = vld [vmem:[%s1308_s6] ss:$0 sm:$0xff] }
 0x364   : > { %1039 = vmatmul.mubr.msk.bf16.vlgmr.msra.gmra.mxu0 %vm332_vm1, %v615_v10 }
 0x365   : > { %1050 = vmatprep.mubr.msk.bf16.mxu0 %vm1115_vm0, %v1114_v0 }
 0x384   : > { %v720_v11 = vpop.xlane.xlu0 %719 }
 0x385   : > { %v721_v12 = vsub.f32 %v717_v56, %v720_v11 }
 0x387   : > { %v722_v13 = vmul.f32 1.442695, %v721_v12 }
 0x388   : > { %v729_v14 = vpop.permute.xlu0 %728 }
 0x389   : > { %1094 = vpow2.f32 %v722_v13  ;;  %v734_v15 = vsel %vm396_vm3, %v729_v14, 0 }
 0x38a   : > { %1049 = vmatpush3.bf16.msra.mxu0 %v734_v15 }
 0x396   : > { %v1095_v16 = vpop.eup %1094 }
 0x397   : > { %v724_v17 = vsel %vm332_vm1, %v1095_v16, 0.0  ;;  %v727_v18 = vpack.c.bf16 %v1095_v16, %v1095_v16 }
 0x398   : > { %725 = vadd.xlane.f32.xlu0 %v724_v17 }
 0x399   : > { %1051 = vmatmul.mubr.msk.bf16.vlgmr.msra.gmra.mxu0 %vm332_vm1, %v727_v18 }
 0x39c   : > { %388 = vadd.xlane.f32.xlu0 %v387_v19 }
 0x3e4   : > { %v502_v20 = vpop.xlane.xlu0 %501 }
 0x3e5   : > { %1096 = vrcp.f32 %v502_v20 }
 0x3ec   : > { %v614_v21 = vpop.xlane.xlu1 %613 }
 0x3ed   : > { %1098 = vrcp.f32 %v614_v21 }
 0x3f2   : > { %v1097_v24 = vpop.eup %1096 }
 0x3fa   : > { %v1099_v30 = vpop.eup %1098 }
 0x41c   : > { %v546_v25 = vpop.f32.mrf.mxu0 }
 0x41d   : > { %v553_v27 = vmul.f32 %v1097_v24, %v546_v25 }
 0x41e   : > { %v1028_v23 = vpop.f32.mrf.mxu0 }
 0x41f   : > { %779 = vrot.lane.b32.xlu0 %v553_v27, %s1127_s27 }
 0x420   : > { %v549_v28 = vpop.f32.mrf.mxu0 }
 0x421   : > { %v726_v37 = vpop.xlane.xlu0 %725 }
 0x422   : > { %v1029_v29 = vpop.f32.mrf.mxu0  ;;  %1100 = vrcp.f32 %v726_v37 }
 0x424   : > { %v658_v31 = vpop.f32.mrf.mxu0 }
 0x425   : > { %v665_v32 = vmul.f32 %v1099_v30, %v658_v31  ;;  %v389_v43 = vpop.xlane.xlu0 %388 }
 0x426   : > { %v1040_v34 = vpop.f32.mrf.mxu0  ;;  %1102 = vrcp.f32 %v389_v43 }
 0x427   : > { %783 = vrot.lane.b32.xlu1 %v665_v32, %s1128_s28 }
 0x428   : > { %v661_v35 = vpop.f32.mrf.mxu0 }
 0x42a   : > { %v1041_v36 = vpop.f32.mrf.mxu0 }
 0x42f   : > { %v1101_v38 = vpop.eup %1100 }
 0x433   : > { %v1103_v44 = vpop.eup %1102 }
 0x434   : > { %v441_v46 = vmul.f32 %v1103_v44, %v1241_v33  ;;  %v979_v33 = vld [vmem:[%s1306_s4] ss:$0 sm:$0xff] }
 0x459   : > { %v770_v39 = vpop.f32.mrf.mxu0 }
 0x45a   : > { %v777_v40 = vmul.f32 %v1101_v38, %v770_v39 }
 0x45b   : > { %v1052_v0 = vpop.f32.mrf.mxu0 }
 0x45c   : > { %787 = vrot.lane.b32.xlu0 %v777_v40, %s1129_s29 }
 0x45d   : > { %v773_v41 = vpop.f32.mrf.mxu0 }
 0x45f   : > { %v1053_v42 = vpop.f32.mrf.mxu0 }
 0x491   : > { %v780_v45 = vpop.permute.xlu0 %779 }
 0x492   : > { %v790_v48 = vsel %vm332_vm1, %v441_v46, %v780_v45 }
 0x499   : > { %v784_v47 = vpop.permute.xlu1 %783 }
 0x49a   : > { %v792_v49 = vsel %vm791_vm4, %v790_v48, %v784_v47 }
 0x4ce   : > { %v788_v50 = vpop.permute.xlu0 %787 }
 0x4cf   : > { %v794_v51 = vsel %vm793_vm5, %v792_v49, %v788_v50 }
 0x4d0   : > { %v795_v52 = vpack.c.bf16 %v794_v51, %v794_v51 }
 0x4d2   : > { %1059 = vmatmul.mubr.msk.bf16.vlgmr.msra.gmra.mxu1 %vm814_vm6, %v795_v52 }
 0x592   : > { %v852_v53 = vpop.f32.mrf.mxu1 }
 0x593   : > { %v853_v55 = vadd.f32 %v979_v33, %v852_v53 }
 0x594   : > { %v1060_v56 = vpop.f32.mrf.mxu1 }
 0x595   : > { %v858_v57 = vadd.f32 %v853_v55, %v308_v54 }
 0x596   : > { %v855_v58 = vpop.f32.mrf.mxu1 }
 0x597   : > { %v859_v59 = vsel %vm814_vm6, %v858_v57, 0.0 }
 0x598   : > { %860 = vadd.xlane.f32.xlu0 %v859_v59  ;;  %v1061_v60 = vpop.f32.mrf.mxu1 }
 0x621   : > { %v861_v61 = vpop.xlane.xlu0 %860 }
 0x622   : > { %v863_v62 = vmul.f32 0.03125, %v861_v61 }
 0x624   : > { %v864_v63 = vsub.f32 %v858_v57, %v863_v62 }
 0x626   : > { %v865_v1 = vmul.f32 %v864_v63, %v864_v63 }
 0x628   : > { %v866_v3 = vsel %vm814_vm6, %v865_v1, 0.0 }
 0x629   : > { %867 = vadd.xlane.f32.xlu1 %v866_v3 }
 0x6b2   : > { %v868_v4 = vpop.xlane.xlu1 %867 }
 0x6b3   : > { %v869_v5 = vmul.f32 0.03125, %v868_v4 }
 0x6b5   : > { %v870_v6 = vadd.f32 1e-05, %v869_v5 }
 0x6b7   : > { %1104 = vrsqrt.f32 %v870_v6 }
 0x6c4   : > { %v1105_v7 = vpop.eup %1104 }
 0x6c5   : > { %v872_v8 = vmul.f32 %v1105_v7, %v864_v63 }
 0x6c7   : > { %v879_v10 = vmul.f32 %v983_v2, %v872_v8 }
 0x6c9   : > { %v886_v11 = vadd.f32 %v984_v9, %v879_v10 }
 0x6cb   : > { %887 = vst.msk [vmem:[%s304_s18] sm:$0xff] %vm814_vm6, %v886_v11 }
 0x6cc PF: > { %s17_s24 = sadd.s32 1, %s1112_s24  }
 0x6cd   : > { %p14_p4 = scmp.ge.s32.totalorder %s17_s24, 4  }
 0x6cf   :  { %16 = sbr.rel (!%p14_p4) target bundleno = 1 (0x1), region = 84 }

// kernel: decoder_forward.17
= control target key start
LH: loop header
LB: loop body
LE: loop exit
PB: predicated region body
PF: predicated region fallthrough
CT: control target
= control target key end

     0   :  { %vm19_vm0 = vcmask 523264   ;;  %v132_v0 = vmov 0.0   ;;  %vm133_vm1 = vmmov 0   ;;  %vm43_vm2 = vcmask 261120   ;;  %s181_s1 = inlined_call_operand.vmem [shape: bf16[32,64], index: 1, kind: input, shape index: {}]   ;;  %s182_s0 = inlined_call_operand.vmem [shape: f32[16,32], index: 0, kind: input, shape index: {}]   ;;  %s183_s2 = inlined_call_operand.vmem [shape: f32[1,64], index: 2, kind: input, shape index: {}]   ;;  %s184_s3 = inlined_call_operand.vmem [shape: f32[16,64], index: 3, kind: output, shape index: {}]  }
   0x1   :  { %120 = vmatprep.subr.bf16.mxu0 %v132_v0  ;;  %v130_v1 = vld [vmem:[%s181_s1 + $0x8] sm:$0xff]   ;;  %124 = vmatprep.mubr.msk.bf16.mxu0 %vm133_vm1, %v132_v0  ;;  %20 = vst.msk [vmem:[#allocation2] sm:$0xff] %vm19_vm0, %v132_v0  ;;  %21 = vst.msk [vmem:[#allocation2 + $0x8] sm:$0xff] %vm19_vm0, %v132_v0  ;;  %v131_v2 = vld [vmem:[%s181_s1] sm:$0xff]  }
   0x2   :  { %121 = vmatpush3.bf16.msra.mxu0 %v130_v1  ;;  %v24_v3 = vld [vmem:[%s182_s0] sm:$0xff]  ;;  %v25_v4 = vld [vmem:[%s182_s0 + $0x8] sm:$0xff] }
   0x3   :  { %122 = vmatprep.subr.bf16.mxu0 %v132_v0  ;;  %v26_v5 = vpack.c.bf16 %v25_v4, %v24_v3  ;;  %v116_v14 = vld [vmem:[%s183_s2] ss:$0 sm:$0xff] }
   0x6   :  { %123 = vmatpush3.bf16.msra.mxu0 %v131_v2 }
   0x8   :  { %v22_v6 = vld [vmem:[#allocation2] sm:$0xff]  ;;  %v23_v10 = vld [vmem:[#allocation2 + $0x8] sm:$0xff] }
   0x9   :  { %125 = vmatmul.mubr.msk.bf16.vlgmr.msra.gmra.mxu0 %vm43_vm2, %v26_v5 }
  0xc9   :  { %v81_v7 = vpop.f32.mrf.mxu0 }
  0xca   :  { %v88_v8 = vadd.f32 %v81_v7, %v22_v6 }
  0xcb   :  { %v126_v9 = vpop.f32.mrf.mxu0 }
  0xcc   :  { %91 = vst.msk [vmem:[#allocation2] sm:$0xff] %vm19_vm0, %v88_v8 }
  0xcd   :  { %v84_v11 = vpop.f32.mrf.mxu0 }
  0xce   :  { %v89_v12 = vadd.f32 %v84_v11, %v23_v10 }
  0xcf   :  { %v127_v13 = vpop.f32.mrf.mxu0 }
  0xd0   :  { %92 = vst.msk [vmem:[#allocation2 + $0x8] sm:$0xff] %vm19_vm0, %v89_v12 }
  0xd3   :  { %v96_v15 = vld [vmem:[#allocation2] sm:$0xff] }
  0xd4   :  { %v105_v16 = vadd.f32 %v116_v14, %v96_v15 }
  0xd6   :  { %107 = vst.msk [vmem:[%s184_s3] sm:$0xff] %vm19_vm0, %v105_v16 }
  0xd7   :  { %v97_v17 = vld [vmem:[#allocation2 + $0x8] sm:$0xff] }
  0xd8   :  { %v106_v18 = vadd.f32 %v116_v14, %v97_v17 }
  0xda   :  { %108 = vst.msk [vmem:[%s184_s3 + $0x8] sm:$0xff] %vm19_vm0, %v106_v18 }

// kernel: decoder_forward.16
= control target key start
LH: loop header
LB: loop body
LE: loop exit
PB: predicated region body
PF: predicated region fallthrough
CT: control target
= control target key end

     0   :  { %vm19_vm0 = vcmask 261120   ;;  %v131_v0 = vmov 0.0   ;;  %vm132_vm1 = vmmov 0   ;;  %s181_s1 = inlined_call_operand.vmem [shape: bf16[32,32], index: 1, kind: input, shape index: {}]   ;;  %s182_s0 = inlined_call_operand.vmem [shape: f32[16,32], index: 0, kind: input, shape index: {}]   ;;  %s183_s2 = inlined_call_operand.vmem [shape: f32[1,32], index: 2, kind: input, shape index: {}]   ;;  %s184_s3 = inlined_call_operand.vmem [shape: f32[16,32], index: 3, kind: output, shape index: {}]  }
   0x1   :  { %119 = vmatprep.subr.bf16.mxu0 %v131_v0  ;;  %v129_v1 = vld [vmem:[%s181_s1 + $0x8] sm:$0xff]   ;;  %123 = vmatprep.mubr.msk.bf16.mxu0 %vm132_vm1, %v131_v0  ;;  %20 = vst.msk [vmem:[#allocation2] sm:$0xff] %vm19_vm0, %v131_v0  ;;  %21 = vst.msk [vmem:[#allocation2 + $0x8] sm:$0xff] %vm19_vm0, %v131_v0  ;;  %v130_v2 = vld [vmem:[%s181_s1] sm:$0xff]  }
   0x2   :  { %120 = vmatpush3.bf16.msra.mxu0 %v129_v1  ;;  %v24_v3 = vld [vmem:[%s182_s0] sm:$0xff]  ;;  %v25_v4 = vld [vmem:[%s182_s0 + $0x8] sm:$0xff] }
   0x3   :  { %121 = vmatprep.subr.bf16.mxu0 %v131_v0  ;;  %v26_v5 = vpack.c.bf16 %v25_v4, %v24_v3  ;;  %v115_v14 = vld [vmem:[%s183_s2] ss:$0 sm:$0xff] }
   0x6   :  { %122 = vmatpush3.bf16.msra.mxu0 %v130_v2 }
   0x8   :  { %v22_v6 = vld [vmem:[#allocation2] sm:$0xff]  ;;  %v23_v10 = vld [vmem:[#allocation2 + $0x8] sm:$0xff] }
   0x9   :  { %124 = vmatmul.mubr.msk.bf16.vlgmr.msra.gmra.mxu0 %vm19_vm0, %v26_v5 }
  0xc9   :  { %v81_v7 = vpop.f32.mrf.mxu0 }
  0xca   :  { %v88_v8 = vadd.f32 %v81_v7, %v22_v6 }
  0xcb   :  { %v125_v9 = vpop.f32.mrf.mxu0 }
  0xcc   :  { %90 = vst.msk [vmem:[#allocation2] sm:$0xff] %vm19_vm0, %v88_v8 }
  0xcd   :  { %v84_v11 = vpop.f32.mrf.mxu0 }
  0xce   :  { %v89_v12 = vadd.f32 %v84_v11, %v23_v10 }
  0xcf   :  { %v126_v13 = vpop.f32.mrf.mxu0 }
  0xd0   :  { %91 = vst.msk [vmem:[#allocation2 + $0x8] sm:$0xff] %vm19_vm0, %v89_v12 }
  0xd3   :  { %v95_v15 = vld [vmem:[#allocation2] sm:$0xff] }
  0xd4   :  { %v104_v16 = vadd.f32 %v115_v14, %v95_v15 }
  0xd6   :  { %106 = vst.msk [vmem:[%s184_s3] sm:$0xff] %vm19_vm0, %v104_v16 }
  0xd7   :  { %v96_v17 = vld [vmem:[#allocation2 + $0x8] sm:$0xff] }
  0xd8   :  { %v105_v18 = vadd.f32 %v115_v14, %v96_v17 }
  0xda   :  { %107 = vst.msk [vmem:[%s184_s3 + $0x8] sm:$0xff] %vm19_vm0, %v105_v18 }

// kernel: decoder_forward.26
= control target key start
LH: loop header
LB: loop body
LE: loop exit
PB: predicated region body
PF: predicated region fallthrough
CT: control target
= control target key end

     0   :  { %vm18_vm0 = vcmask 261120   ;;  %s118_s0 = inlined_call_operand.vmem [shape: f32[16,32], index: 0, kind: input, shape index: {}]   ;;  %s119_s1 = inlined_call_operand.vmem [shape: f32[1,32], index: 1, kind: input, shape index: {}]   ;;  %s120_s2 = inlined_call_operand.vmem [shape: f32[1,32], index: 2, kind: input, shape index: {}]   ;;  %s121_s3 = inlined_call_operand.vmem [shape: f32[16,32], index: 3, kind: output, shape index: {}]  }
   0x1   :  { %v14_v0 = vld [vmem:[%s118_s0] sm:$0xff]  ;;  %v15_v1 = vld [vmem:[%s118_s0 + $0x8] sm:$0xff] }
   0x2   :  { %v19_v2 = vsel %vm18_vm0, %v14_v0, 0.0  ;;  %v22_v3 = vsel %vm18_vm0, %v15_v1, 0.0  ;;  %v68_v21 = vld [vmem:[%s119_s1] ss:$0 sm:$0xff] }
   0x3   :  { %20 = vadd.xlane.f32.xlu0 %v19_v2  ;;  %v69_v23 = vld [vmem:[%s120_s2] ss:$0 sm:$0xff] }
   0x7   :  { %23 = vadd.xlane.f32.xlu0 %v22_v3 }
  0x8c   :  { %v21_v4 = vpop.xlane.xlu0 %20 }
  0x8d   :  { %v26_v5 = vmul.f32 0.03125, %v21_v4 }
  0x8f   :  { %v28_v6 = vsub.f32 %v14_v0, %v26_v5 }
  0x90   :  { %v24_v7 = vpop.xlane.xlu0 %23 }
  0x91   :  { %v27_v8 = vmul.f32 0.03125, %v24_v7  ;;  %v30_v9 = vmul.f32 %v28_v6, %v28_v6 }
  0x93   :  { %v29_v10 = vsub.f32 %v15_v1, %v27_v8  ;;  %v32_v11 = vsel %vm18_vm0, %v30_v9, 0.0 }
  0x94   :  { %33 = vadd.xlane.f32.xlu1 %v32_v11 }
  0x95   :  { %v31_v12 = vmul.f32 %v29_v10, %v29_v10 }
  0x97   :  { %v35_v13 = vsel %vm18_vm0, %v31_v12, 0.0 }
  0x98   :  { %36 = vadd.xlane.f32.xlu1 %v35_v13 }
 0x11d   :  { %v34_v14 = vpop.xlane.xlu1 %33 }
 0x11e   :  { %v38_v15 = vmul.f32 0.03125, %v34_v14 }
 0x120   :  { %v40_v16 = vadd.f32 1e-05, %v38_v15 }
 0x121   :  { %v37_v17 = vpop.xlane.xlu1 %36 }
 0x122   :  { %70 = vrsqrt.f32 %v40_v16  ;;  %v39_v18 = vmul.f32 0.03125, %v37_v17 }
 0x124   :  { %v41_v19 = vadd.f32 1e-05, %v39_v18 }
 0x126   :  { %72 = vrsqrt.f32 %v41_v19 }
 0x12f   :  { %v71_v20 = vpop.eup %70 }
 0x130   :  { %v44_v22 = vmul.f32 %v71_v20, %v28_v6 }
 0x132   :  { %v52_v24 = vmul.f32 %v68_v21, %v44_v22 }
 0x133   :  { %v73_v25 = vpop.eup %72 }
 0x134   :  { %v60_v26 = vadd.f32 %v69_v23, %v52_v24  ;;  %v45_v27 = vmul.f32 %v73_v25, %v29_v10 }
 0x136   :  { %62 = vst.msk [vmem:[%s121_s3] sm:$0xff] %vm18_vm0, %v60_v26  ;;  %v53_v28 = vmul.f32 %v68_v21, %v45_v27 }
 0x138   :  { %v61_v29 = vadd.f32 %v69_v23, %v53_v28 }
 0x13a   :  { %63 = vst.msk [vmem:[%s121_s3 + $0x8] sm:$0xff] %vm18_vm0, %v61_v29 }

// kernel: decoder_forward.27
= control target key start
LH: loop header
LB: loop body
LE: loop exit
PB: predicated region body
PF: predicated region fallthrough
CT: control target
= control target key end

     0   :  { %v170_v1 = vmov 0.0   ;;  %vm171_vm0 = vmmov 0   ;;  %vm20_vm1 = vcmask 130048   ;;  %s219_s0 = inlined_call_operand.vmem [shape: f32[16,32], index: 0, kind: input, shape index: {}]   ;;  %s220_s1 = inlined_call_operand.vmem [shape: bf16[32,16], index: 1, kind: input, shape index: {}]   ;;  %s221_s2 = inlined_call_operand.vmem [shape: f32[1,16], index: 2, kind: input, shape index: {}]   ;;  %s222_s3 = inlined_call_operand.hbm [shape: f32[16,16], index: 3, kind: output, shape index: {}]  }
   0x1   :  { %v146_v0 = vld [vmem:[%s220_s1 + $0x8] sm:$0xff]   ;;  %133 = vmatprep.subr.bf16.mxu0 %v170_v1  ;;  %v147_v2 = vld [vmem:[%s220_s1] sm:$0xff]   ;;  %137 = vmatprep.mubr.msk.bf16.mxu0 %vm171_vm0, %v170_v1 }
   0x2   :  { %134 = vmatpush3.bf16.msra.mxu0 %v146_v0  ;;  %v25_v3 = vld [vmem:[%s219_s0] sm:$0xff]  ;;  %v26_v4 = vld [vmem:[%s219_s0 + $0x8] sm:$0xff] }
   0x3   :  { %8 = vsyncpa [#allocation4], 0  ;;  %135 = vmatprep.subr.bf16.mxu0 %v170_v1  ;;  %21 = vst.msk [vmem:[#allocation2] sm:$0xff] %vm20_vm1, %v170_v1  ;;  %v27_v5 = vpack.c.bf16 %v26_v4, %v25_v3  ;;  %vm44_vm2 = vcmask 261120   ;;  %v129_v14 = vld [vmem:[%s221_s2] ss:$0 sm:$0xff] }
   0x4   :  { %22 = vst.msk [vmem:[#allocation2 + $0x8] sm:$0xff] %vm20_vm1, %v170_v1  ;;  %s172_s20 = smov [#allocation3]  }
   0x5   :  { %s115_s21 = sshll.u32 %s172_s20, 4  ;;  %s116_s21 = int_to_ptr.vmem [resolvable:$true] %s115_s21 }
   0x6   :  { %136 = vmatpush3.bf16.msra.mxu0 %v147_v2  ;;  %s148_s22 = scalar_lea.vmem %s116_s21, 256  ;;  %p153_p1 = scmp.lt.s32.totalorder %s116_s21, %s116_s21 }
   0x7   :  { %p149_p0 = scmp.ne.s32.totalorder %s116_s21, %s148_s22  ;;  %p154_p2 = scmp.lt.s32.totalorder %s148_s22, %s148_s22 }
   0x9   :  { %138 = vmatmul.mubr.msk.bf16.vlgmr.msra.gmra.mxu0 %vm44_vm2, %v27_v5  ;;  %p155_p3 = por %p154_p2, %p153_p1 }
   0xa   :  { %v23_v6 = vld [vmem:[#allocation2] sm:$0xff] }
   0xb   :  { %v24_v10 = vld [vmem:[#allocation2 + $0x8] sm:$0xff]  ;;  %p156_p4 = pnand %p155_p3, %p149_p0 }
  0xc9   :  { %v82_v7 = vpop.f32.mrf.mxu0 }
  0xca   :  { %v89_v8 = vadd.f32 %v82_v7, %v23_v6 }
  0xcb   :  { %v139_v9 = vpop.f32.mrf.mxu0 }
  0xcc   :  { %92 = vst.msk [vmem:[#allocation2] sm:$0xff] %vm20_vm1, %v89_v8 }
  0xcd   :  { %v85_v11 = vpop.f32.mrf.mxu0 }
  0xce   :  { %v90_v12 = vadd.f32 %v85_v11, %v24_v10 }
  0xcf   :  { %v140_v13 = vpop.f32.mrf.mxu0 }
  0xd0   :  { %93 = vst.msk [vmem:[#allocation2 + $0x8] sm:$0xff] %vm20_vm1, %v90_v12 }
  0xd3   :  { %v97_v15 = vld [vmem:[#allocation2] sm:$0xff] }
  0xd4   :  { %v106_v16 = vadd.f32 %v129_v14, %v97_v15 }
  0xd6   :  { %108 = vst.msk [vmem:[#allocation3] sm:$0xff] %vm20_vm1, %v106_v16 }
  0xd7   :  { %v98_v17 = vld [vmem:[#allocation2 + $0x8] sm:$0xff] }
  0xd8   :  { %v107_v18 = vadd.f32 %v129_v14, %v98_v17 }
  0xda   :  { %109 = vst.msk [vmem:[#allocation3 + $0x8] sm:$0xff] %vm20_vm1, %v107_v18 }
  0xdb   :  { %159 = shalt.err (!%p156_p4)
}
  0xdc   :  { %s173_s23 = smov 128   ;;  %s174_s2 = smov 8  }
  0xdd   :  { %121 = dma.vmem_to_hbm [thread:$0]  %s116_s21, 256, %s222_s3, [#allocation4], %s173_s23, %s173_s23, %s174_s2  }
  0xde   :  { %168 = dma.done.wait [#allocation4], 256  }
  0xdf   :  { %169 = vsyncadd [#allocation4], 4294967040 }
  0xe0   :  { %125 = vsyncpa [#allocation4], 1 }

// kernel: decoder_forward.19
= control target key start
LH: loop header
LB: loop body
LE: loop exit
PB: predicated region body
PF: predicated region fallthrough
CT: control target
= control target key end

     0   :  { %vm34_vm0 = vcmask 261120   ;;  %v327_v0 = vmov 0.0   ;;  %vm328_vm1 = vmmov 0   ;;  %vm153_vm2 = vcmask 523264   ;;  %s433_s1 = inlined_call_operand.vmem [shape: bf16[32,64], index: 1, kind: input, shape index: {}]   ;;  %s434_s0 = inlined_call_operand.vmem [shape: f32[16,32], index: 0, kind: input, shape index: {}, may-alias: {0,5}]   ;;  %s435_s3 = inlined_call_operand.vmem [shape: bf16[64,32], index: 3, kind: input, shape index: {}]   ;;  %s436_s2 = inlined_call_operand.vmem [shape: f32[1,64], index: 2, kind: input, shape index: {}]   ;;  %s437_s4 = inlined_call_operand.vmem [shape: f32[1,32], index: 4, kind: input, shape index: {}]   ;;  %s438_s5 = inlined_call_operand.vmem [shape: f32[16,32], index: 5, kind: input, shape index: {}, may-alias: {0,5}]   ;;  %s439_s6 = inlined_call_operand.vmem [shape: f32[1,32], index: 6, kind: input, shape index: {}]   ;;  %s440_s7 = inlined_call_operand.vmem [shape: f32[1,32], index: 7, kind: input, shape index: {}]   ;;  %s441_s8 = inlined_call_operand.vmem [shape: f32[16,32], index: 8, kind: output, shape index: {}]  }
   0x1   :  { %291 = vmatprep.subr.bf16.mxu0 %v327_v0  ;;  %v313_v1 = vld [vmem:[%s433_s1 + $0x8] sm:$0xff]   ;;  %295 = vmatprep.mubr.msk.bf16.mxu0 %vm328_vm1, %v327_v0  ;;  %35 = vst.msk [vmem:[#allocation2] sm:$0xff] %vm34_vm0, %v327_v0  ;;  %36 = vst.msk [vmem:[#allocation2 + $0x8] sm:$0xff] %vm34_vm0, %v327_v0  ;;  %v314_v2 = vld [vmem:[%s433_s1] sm:$0xff]  }
   0x2   :  { %299 = vmatprep.subr.bf16.mxu1 %v327_v0  ;;  %307 = vmatprep.mubr.msk.bf16.mxu1 %vm328_vm1, %v327_v0  ;;  %v37_v3 = vld [vmem:[%s434_s0] sm:$0xff]  ;;  %v38_v4 = vld [vmem:[%s434_s0 + $0x8] sm:$0xff]  ;;  %v315_v6 = vld [vmem:[%s435_s3 + $0x18] sm:$0xff]  }
   0x3   :  { %292 = vmatpush3.bf16.msra.mxu0 %v313_v1  ;;  %v39_v5 = vpack.c.bf16 %v38_v4, %v37_v3  ;;  %300 = vmatpush3.bf16.msra.mxu1 %v315_v6  ;;  %v316_v7 = vld [vmem:[%s435_s3 + $0x10] sm:$0xff]   ;;  %v317_v8 = vld [vmem:[%s435_s3 + $0x8] sm:$0xff]   ;;  %v318_v9 = vld [vmem:[%s435_s3] sm:$0xff]  }
   0x4   :  { %293 = vmatprep.subr.bf16.mxu0 %v327_v0  ;;  %301 = vmatprep.subr.bf16.mxu1 %v327_v0  ;;  %v271_v10 = vld [vmem:[%s436_s2] ss:$0 sm:$0xff]  ;;  %v217_v42 = vld [vmem:[%s438_s5 + $0x8] sm:$0xff] }
   0x5   :  { %v280_v36 = vld [vmem:[%s437_s4] ss:$0 sm:$0xff] }
   0x6   :  { %v216_v38 = vld [vmem:[%s438_s5] sm:$0xff] }
   0x7   :  { %294 = vmatpush3.bf16.msra.mxu0 %v314_v2  ;;  %302 = vmatpush3.bf16.msra.mxu1 %v316_v7  ;;  %v282_v2 = vld [vmem:[%s440_s7] ss:$0 sm:$0xff] }
   0x8   :  { %303 = vmatprep.subr.bf16.mxu1 %v327_v0  ;;  %v118_v28 = vld [vmem:[#allocation2] sm:$0xff]  ;;  %v119_v32 = vld [vmem:[#allocation2 + $0x8] sm:$0xff] }
   0xa   :  { %296 = vmatmul.mubr.msk.bf16.vlgmr.msra.gmra.mxu0 %vm34_vm0, %v39_v5 }
   0xb   :  { %304 = vmatpush3.bf16.msra.mxu1 %v317_v8 }
   0xc   :  { %305 = vmatprep.subr.bf16.mxu1 %v327_v0  ;;  %v281_v0 = vld [vmem:[%s439_s6] ss:$0 sm:$0xff] }
   0xf   :  { %306 = vmatpush3.bf16.msra.mxu1 %v318_v9 }
  0xca   :  { %v101_v11 = vpop.f32.mrf.mxu0 }
  0xcb   :  { %v102_v12 = vadd.f32 %v271_v10, %v101_v11 }
  0xcc   :  { %v297_v13 = vpop.f32.mrf.mxu0 }
  0xcd   :  { %v110_v14 = vmul.f32 0.70710677, %v102_v12  ;;  %v108_v22 = vmul.f32 0.5, %v102_v12 }
  0xce   :  { %v104_v15 = vpop.f32.mrf.mxu0 }
  0xcf   :  { %319 = verf.f32 %v110_v14  ;;  %v105_v16 = vadd.f32 %v271_v10, %v104_v15 }
  0xd0   :  { %v298_v17 = vpop.f32.mrf.mxu0 }
  0xd1   :  { %v111_v18 = vmul.f32 0.70710677, %v105_v16  ;;  %v109_v23 = vmul.f32 0.5, %v105_v16 }
  0xd3   :  { %321 = verf.f32 %v111_v18 }
  0xdc   :  { %v320_v19 = vpop.eup %319 }
  0xdd   :  { %v114_v20 = vadd.f32 1.0, %v320_v19 }
  0xdf   :  { %v116_v25 = vmul.f32 %v114_v20, %v108_v22 }
  0xe0   :  { %v322_v21 = vpop.eup %321 }
  0xe1   :  { %v115_v24 = vadd.f32 1.0, %v322_v21 }
  0xe3   :  { %v117_v26 = vmul.f32 %v115_v24, %v109_v23 }
  0xe5   :  { %v120_v27 = vpack.c.bf16 %v117_v26, %v116_v25 }
  0xe7   :  { %308 = vmatmul.mubr.msk.bf16.vlgmr.msra.gmra.mxu1 %vm153_vm2, %v120_v27 }
 0x1a7   :  { %v191_v29 = vpop.f32.mrf.mxu1 }
 0x1a8   :  { %v198_v30 = vadd.f32 %v191_v29, %v118_v28 }
 0x1a9   :  { %v309_v31 = vpop.f32.mrf.mxu1 }
 0x1aa   :  { %200 = vst.msk [vmem:[#allocation2] sm:$0xff] %vm34_vm0, %v198_v30 }
 0x1ab   :  { %v194_v33 = vpop.f32.mrf.mxu1 }
 0x1ac   :  { %v199_v34 = vadd.f32 %v194_v33, %v119_v32 }
 0x1ad   :  { %v310_v35 = vpop.f32.mrf.mxu1 }
 0x1ae   :  { %201 = vst.msk [vmem:[#allocation2 + $0x8] sm:$0xff] %vm34_vm0, %v199_v34 }
 0x1b1   :  { %v205_v37 = vld [vmem:[#allocation2] sm:$0xff] }
 0x1b2   :  { %v214_v39 = vadd.f32 %v280_v36, %v205_v37 }
 0x1b4   :  { %v218_v40 = vadd.f32 %v216_v38, %v214_v39 }
 0x1b5   :  { %v206_v41 = vld [vmem:[#allocation2 + $0x8] sm:$0xff] }
 0x1b6   :  { %v222_v43 = vsel %vm34_vm0, %v218_v40, 0.0  ;;  %v215_v44 = vadd.f32 %v280_v36, %v206_v41 }
 0x1b7   :  { %223 = vadd.xlane.f32.xlu0 %v222_v43 }
 0x1b8   :  { %v219_v45 = vadd.f32 %v217_v42, %v215_v44 }
 0x1ba   :  { %v225_v46 = vsel %vm34_vm0, %v219_v45, 0.0 }
 0x1bb   :  { %226 = vadd.xlane.f32.xlu0 %v225_v46 }
 0x240   :  { %v224_v47 = vpop.xlane.xlu0 %223 }
 0x241   :  { %v229_v48 = vmul.f32 0.03125, %v224_v47 }
 0x243   :  { %v231_v49 = vsub.f32 %v218_v40, %v229_v48 }
 0x244   :  { %v227_v50 = vpop.xlane.xlu0 %226 }
 0x245   :  { %v230_v51 = vmul.f32 0.03125, %v227_v50  ;;  %v233_v52 = vmul.f32 %v231_v49, %v231_v49 }
 0x247   :  { %v232_v53 = vsub.f32 %v219_v45, %v230_v51  ;;  %v235_v54 = vsel %vm34_vm0, %v233_v52, 0.0 }
 0x248   :  { %236 = vadd.xlane.f32.xlu1 %v235_v54 }
 0x249   :  { %v234_v55 = vmul.f32 %v232_v53, %v232_v53 }
 0x24b   :  { %v238_v56 = vsel %vm34_vm0, %v234_v55, 0.0 }
 0x24c   :  { %239 = vadd.xlane.f32.xlu1 %v238_v56 }
 0x2d1   :  { %v237_v57 = vpop.xlane.xlu1 %236 }
 0x2d2   :  { %v241_v58 = vmul.f32 0.03125, %v237_v57 }
 0x2d4   :  { %v243_v59 = vadd.f32 1e-05, %v241_v58 }
 0x2d5   :  { %v240_v60 = vpop.xlane.xlu1 %239 }
 0x2d6   :  { %323 = vrsqrt.f32 %v243_v59  ;;  %v242_v61 = vmul.f32 0.03125, %v240_v60 }
 0x2d8   :  { %v244_v62 = vadd.f32 1e-05, %v242_v61 }
 0x2da   :  { %325 = vrsqrt.f32 %v244_v62 }
 0x2e3   :  { %v324_v63 = vpop.eup %323 }
 0x2e4   :  { %v247_v1 = vmul.f32 %v324_v63, %v231_v49 }
 0x2e6   :  { %v255_v3 = vmul.f32 %v281_v0, %v247_v1 }
 0x2e7   :  { %v326_v4 = vpop.eup %325 }
 0x2e8   :  { %v263_v5 = vadd.f32 %v282_v2, %v255_v3  ;;  %v248_v6 = vmul.f32 %v326_v4, %v232_v53 }
 0x2ea   :  { %265 = vst.msk [vmem:[%s441_s8] sm:$0xff] %vm34_vm0, %v263_v5  ;;  %v256_v7 = vmul.f32 %v281_v0, %v248_v6 }
 0x2ec   :  { %v264_v8 = vadd.f32 %v282_v2, %v256_v7 }
 0x2ee   :  { %266 = vst.msk [vmem:[%s441_s8 + $0x8] sm:$0xff] %vm34_vm0, %v264_v8 }

// kernel: decoder_forward.18
= control target key start
LH: loop header
LB: loop body
LE: loop exit
PB: predicated region body
PF: predicated region fallthrough
CT: control target
= control target key end

     0   :  { %s1219_s27 = smov 0   ;;  %s1347_s0 = inlined_call_operand.vmem [shape: f32[2,8,32], index: 0, kind: input, shape index: {}]   ;;  %s1348_s1 = inlined_call_operand.vmem [shape: f32[2,8,64], index: 1, kind: input, shape index: {}]   ;;  %s1349_s2 = inlined_call_operand.vmem [shape: f32[2,8,32], index: 2, kind: input, shape index: {}]   ;;  %s1350_s3 = inlined_call_operand.vmem [shape: f32[2,1,8], index: 3, kind: input, shape index: {}]   ;;  %s1351_s4 = inlined_call_operand.vmem [shape: bf16[32,32], index: 4, kind: input, shape index: {}]   ;;  %s1352_s5 = inlined_call_operand.vmem [shape: f32[1,32], index: 5, kind: input, shape index: {}]   ;;  %s1353_s6 = inlined_call_operand.vmem [shape: f32[1,32], index: 6, kind: input, shape index: {}]   ;;  %s1354_s7 = inlined_call_operand.vmem [shape: f32[1,32], index: 7, kind: input, shape index: {}]   ;;  %s1355_s8 = inlined_call_operand.vmem [shape: f32[2,8,32], index: 8, kind: output, shape index: {}]  }
   0x1 LB: > { %s1013_s28 = sadd.s32 4294967295, %s1160_s27   ;;  %p1017_p0 = scmp.ge.s32.totalorder %s1160_s27, 1  ;;  %s1160_s27 = sphi %s1219_s27, %s18_s27  }
   0x2   : > { %p287_p1 = scmp.lt.s32.totalorder %s1160_s27, 3 }
   0x4   : > { %p288_p2 = pnand %p1017_p0, %p287_p1 }
   0x5   : > { %p330_p3 = scmp.lt.s32.totalorder (!%p288_p2), %s1013_s28, 1  ;;  %s1164_s14 = smov (!%p288_p2), 120  }
   0x6   : > { %291 = sbr.rel (%p288_p2) target bundleno = 1580 (0x62c), region = 52  ;;  %s1165_s15 = smov (!%p288_p2), 112  }
   0x7   : > { %s1166_s16 = smov (!%p288_p2), 104   ;;  %s1167_s20 = smov (!%p288_p2), 96  }
   0x8   : > { %s1168_s21 = smov (!%p288_p2), 88   ;;  %s1169_s22 = smov (!%p288_p2), 72  }
   0x9   : > { %s1170_s23 = smov (!%p288_p2), 80   ;;  %s1171_s26 = smov (!%p288_p2), 8  }
   0xa   : > { %s1172_s9 = smov (!%p288_p2), 16  }
   0xb   : > { %v1162_v0 = vmov 0.0   ;;  %vm1163_vm0 = vmmov 0   ;;  %s1357_s28 = smov (!%p330_p3, %s1013_s28), 1  ;;  %vm363_vm1 = vcmask 64512   ;;  %vm434_vm2 = vcmask 1043456  }
   0xc   : > { %1058 = vmatprep.subr.bf16.mxu0 %v1162_v0  ;;  %1060 = vmatprep.mubr.msk.bf16.mxu0 %vm1163_vm0, %v1162_v0  ;;  %s1233_s29 = sshll.u32 %s1357_s28, 3  ;;  %s344_s19 = scalar_lea.vmem %s1350_s3, %s1357_s28  ;;  %vm830_vm3 = vcmask 130048   ;;  %vm832_vm4 = vcmask 195584   ;;  %vm853_vm5 = vcmask 261120  }
   0xd   : > { %1064 = vmatprep.subr.bf16.mxu1 %v1162_v0  ;;  %1066 = vmatprep.mubr.msk.bf16.mxu1 %vm1163_vm0, %v1162_v0  ;;  %s337_s10 = scalar_lea.vmem %s1348_s1, %s1233_s29  ;;  %s333_s13 = scalar_lea.vmem %s1347_s0, %s1233_s29  ;;  %v1257_v7 = vld [vmem:[%s344_s19] ss:$0 sm:$0xff] }
   0xe   : > { %v350_v1 = vld [vmem:[%s337_s10] sm:$0xff]  ;;  %s1173_s10 = smov 24  }
   0xf   : > { %v1239_v2 = vpack.c.bf16 %v350_v1, %v350_v1  ;;  %v351_v4 = vld [vmem:[%s333_s13] sm:$0xff]  ;;  %s341_s13 = scalar_lea.vmem %s1349_s2, %s1233_s29 }
  0x10   : > { %v361_v5 = vpack.c.bf16 %v351_v4, %v351_v4 }
  0x11   : > { %v368_v3 = vsel %vm363_vm1, %v1239_v2, 0  ;;  %483 = vrot.lane.b32.xlu1 %v1239_v2, %s1164_s14 }
  0x12   : > { %1059 = vmatpush3.bf16.xpose.msra.mxu0 %v368_v3 }
  0x13   : > { %1076 = vmatprep.subr.bf16.mxu0 %v1162_v0 }
  0x15   : > { %481 = vrot.lane.b32.xlu1 %v361_v5, %s1164_s14 }
  0x19   : > { %1061 = vmatmul.mubr.msk.bf16.vlgmr.msra.gmra.mxu0 %vm363_vm1, %v361_v5  ;;  %595 = vrot.lane.b32.xlu1 %v1239_v2, %s1165_s15 }
  0x1a   : > { %1078 = vmatprep.mubr.msk.bf16.mxu0 %vm1163_vm0, %v1162_v0 }
  0x1d   : > { %593 = vrot.lane.b32.xlu1 %v361_v5, %s1165_s15 }
  0x21   : > { %707 = vrot.lane.b32.xlu1 %v1239_v2, %s1166_s16 }
  0x25   : > { %705 = vrot.lane.b32.xlu1 %v361_v5, %s1166_s16 }
  0x83   : > { %v484_v19 = vpop.permute.xlu1 %483 }
  0x84   : > { %v489_v22 = vsel %vm363_vm1, %v484_v19, 0  ;;  %v1134_v19 = vld [vmem:[%s1351_s4 + $0x8] sm:$0xff]  }
  0x87   : > { %v482_v20 = vpop.permute.xlu1 %481 }
  0x8b   : > { %v596_v24 = vpop.permute.xlu1 %595 }
  0x8c   : > { %v601_v26 = vsel %vm363_vm1, %v596_v24, 0 }
  0x8f   : > { %v594_v25 = vpop.permute.xlu1 %593 }
  0x93   : > { %v708_v27 = vpop.permute.xlu1 %707 }
  0x94   : > { %v713_v28 = vsel %vm363_vm1, %v708_v27, 0 }
  0x97   : > { %v706_v29 = vpop.permute.xlu1 %705 }
  0xd9   : > { %v404_v6 = vpop.f32.mrf.mxu0 }
  0xda   : > { %v410_v8 = vmul.f32 0.35355338, %v404_v6 }
  0xdb   : > { %v1062_v9 = vpop.f32.mrf.mxu0 }
  0xdc   : > { %v417_v10 = vadd.f32 %v1257_v7, %v410_v8 }
  0xdd   : > { %v407_v11 = vpop.f32.mrf.mxu0 }
  0xde   : > { %v418_v12 = vsel %vm363_vm1, %v417_v10, -inf }
  0xdf   : > { %419 = vmax.xlane.f32.xlu0 %v418_v12  ;;  %v1063_v13 = vpop.f32.mrf.mxu0 }
  0xf5   : > { %429 = vrot.lane.b32.xlu0 %v1239_v2, %s1167_s20 }
 0x168   : > { %v420_v14 = vpop.xlane.xlu0 %419 }
 0x169   : > { %v421_v15 = vsub.f32 %v417_v10, %v420_v14 }
 0x16b   : > { %v422_v16 = vmul.f32 1.442695, %v421_v15 }
 0x16c   : > { %v430_v17 = vpop.permute.xlu0 %429 }
 0x16d   : > { %1136 = vpow2.f32 %v422_v16  ;;  %v436_v18 = vsel %vm434_vm2, %v430_v17, 0 }
 0x16e   : > { %1065 = vmatpush3.bf16.msra.mxu1 %v436_v18 }
 0x16f   : > { %1070 = vmatprep.subr.bf16.mxu1 %v1162_v0 }
 0x17a   : > { %v1264_v21 = vpop.eup %1136 }
 0x17b   : > { %v427_v23 = vpack.c.bf16 %v1264_v21, %v1264_v21  ;;  %v424_v8 = vsel %vm363_vm1, %v1264_v21, 0.0 }
 0x17d   : > { %1067 = vmatmul.mubr.msk.bf16.vlgmr.msra.gmra.mxu1 %vm363_vm1, %v427_v23 }
 0x17e   : > { %1071 = vmatpush3.bf16.xpose.msra.mxu1 %v489_v22  ;;  %1072 = vmatprep.mubr.msk.bf16.mxu1 %vm1163_vm0, %v1162_v0 }
 0x17f   : > { %1082 = vmatprep.subr.bf16.mxu1 %v1162_v0 }
 0x185   : > { %1073 = vmatmul.mubr.msk.bf16.vlgmr.msra.gmra.mxu1 %vm363_vm1, %v482_v20 }
 0x186   : > { %1083 = vmatpush3.bf16.xpose.msra.mxu1 %v601_v26  ;;  %1084 = vmatprep.mubr.msk.bf16.mxu1 %vm1163_vm0, %v1162_v0  ;;  %v1135_v26 = vld [vmem:[%s1351_s4] sm:$0xff]  }
 0x187   : > { %1094 = vmatprep.subr.bf16.mxu1 %v1162_v0 }
 0x18d   : > { %1085 = vmatmul.mubr.msk.bf16.vlgmr.msra.gmra.mxu1 %vm363_vm1, %v594_v25 }
 0x18e   : > { %1095 = vmatpush3.bf16.xpose.msra.mxu1 %v713_v28  ;;  %1096 = vmatprep.mubr.msk.bf16.mxu1 %vm1163_vm0, %v1162_v0 }
 0x18f   : > { %1106 = vmatprep.subr.bf16.mxu1 %v1162_v0 }
 0x195   : > { %1097 = vmatmul.mubr.msk.bf16.vlgmr.msra.gmra.mxu1 %vm363_vm1, %v706_v29 }
 0x196   : > { %1110 = vmatprep.mubr.msk.bf16.mxu1 %vm1163_vm0, %v1162_v0  ;;  %1107 = vmatpush3.bf16.msra.mxu1 %v1134_v19 }
 0x197   : > { %1108 = vmatprep.subr.bf16.mxu1 %v1162_v0 }
 0x19a   : > { %1109 = vmatpush3.bf16.msra.mxu1 %v1135_v26 }
 0x23d   : > { %v1286_v30 = vpop.f32.mrf.mxu1 }
 0x23f   : > { %v1068_v31 = vpop.f32.mrf.mxu1 }
 0x241   : > { %v475_v32 = vpop.f32.mrf.mxu1 }
 0x243   : > { %v1069_v33 = vpop.f32.mrf.mxu1 }
 0x245   : > { %v525_v34 = vpop.f32.mrf.mxu1 }
 0x246   : > { %v531_v35 = vmul.f32 0.35355338, %v525_v34 }
 0x247   : > { %v1074_v36 = vpop.f32.mrf.mxu1 }
 0x248   : > { %v532_v37 = vadd.f32 %v1257_v7, %v531_v35 }
 0x249   : > { %v528_v38 = vpop.f32.mrf.mxu1 }
 0x24a   : > { %v533_v39 = vsel %vm363_vm1, %v532_v37, -inf }
 0x24b   : > { %534 = vmax.xlane.f32.xlu1 %v533_v39  ;;  %v1075_v40 = vpop.f32.mrf.mxu1 }
 0x24d   : > { %v637_v41 = vpop.f32.mrf.mxu1 }
 0x24e   : > { %v643_v42 = vmul.f32 0.35355338, %v637_v41 }
 0x24f   : > { %v1086_v43 = vpop.f32.mrf.mxu1 }
 0x250   : > { %v644_v44 = vadd.f32 %v1257_v7, %v643_v42 }
 0x251   : > { %v640_v45 = vpop.f32.mrf.mxu1 }
 0x252   : > { %v645_v46 = vsel %vm363_vm1, %v644_v44, -inf }
 0x253   : > { %646 = vmax.xlane.f32.xlu0 %v645_v46  ;;  %v1087_v47 = vpop.f32.mrf.mxu1 }
 0x255   : > { %v749_v48 = vpop.f32.mrf.mxu1 }
 0x256   : > { %v755_v49 = vmul.f32 0.35355338, %v749_v48 }
 0x257   : > { %v1098_v50 = vpop.f32.mrf.mxu1 }
 0x258   : > { %v756_v51 = vadd.f32 %v1257_v7, %v755_v49  ;;  %v1031_v50 = vld [vmem:[%s1352_s5] ss:$0 sm:$0xff] }
 0x259   : > { %v752_v52 = vpop.f32.mrf.mxu1 }
 0x25a   : > { %v757_v53 = vsel %vm363_vm1, %v756_v51, -inf }
 0x25b   : > { %758 = vmax.xlane.f32.xlu0 %v757_v53  ;;  %v1099_v54 = vpop.f32.mrf.mxu1 }
 0x25c   : > { %543 = vrot.lane.b32.xlu1 %v1239_v2, %s1168_s21 }
 0x260   : > { %767 = vrot.lane.b32.xlu1 %v1239_v2, %s1169_s22  ;;  %s348_s22 = scalar_lea.vmem %s1355_s8, %s1233_s29 }
 0x271   : > { %655 = vrot.lane.b32.xlu0 %v1239_v2, %s1170_s23 }
 0x2d4   : > { %v535_v55 = vpop.xlane.xlu1 %534 }
 0x2d5   : > { %v536_v56 = vsub.f32 %v532_v37, %v535_v55 }
 0x2d7   : > { %v537_v57 = vmul.f32 1.442695, %v536_v56 }
 0x2d8   : > { %v544_v58 = vpop.permute.xlu1 %543 }
 0x2d9   : > { %1138 = vpow2.f32 %v537_v57  ;;  %v549_v59 = vsel %vm434_vm2, %v544_v58, 0 }
 0x2da   : > { %1077 = vmatpush3.bf16.msra.mxu0 %v549_v59 }
 0x2db   : > { %1088 = vmatprep.subr.bf16.mxu0 %v1162_v0 }
 0x2dc   : > { %v647_v60 = vpop.xlane.xlu0 %646  ;;  %v768_v9 = vpop.permute.xlu1 %767 }
 0x2dd   : > { %v648_v61 = vsub.f32 %v644_v44, %v647_v60  ;;  %v773_v11 = vsel %vm434_vm2, %v768_v9, 0 }
 0x2df   : > { %v649_v62 = vmul.f32 1.442695, %v648_v61 }
 0x2e1   : > { %1140 = vpow2.f32 %v649_v62 }
 0x2e4   : > { %v759_v63 = vpop.xlane.xlu0 %758 }
 0x2e5   : > { %v760_v1 = vsub.f32 %v756_v51, %v759_v63  ;;  %v353_v51 = vld [vmem:[%s341_s13] sm:$0xff] }
 0x2e6   : > { %v1139_v3 = vpop.eup %1138 }
 0x2e7   : > { %v761_v4 = vmul.f32 1.442695, %v760_v1  ;;  %v539_v2 = vsel %vm363_vm1, %v1139_v3, 0.0  ;;  %v542_v5 = vpack.c.bf16 %v1139_v3, %v1139_v3 }
 0x2e8   : > { %540 = vadd.xlane.f32.xlu1 %v539_v2  ;;  %v656_v6 = vpop.permute.xlu0 %655  ;;  %v1035_v2 = vld [vmem:[%s1353_s6] ss:$0 sm:$0xff] }
 0x2e9   : > { %1142 = vpow2.f32 %v761_v4  ;;  %v661_v7 = vsel %vm434_vm2, %v656_v6, 0  ;;  %1079 = vmatmul.mubr.msk.bf16.vlgmr.msra.gmra.mxu0 %vm363_vm1, %v542_v5  ;;  %v1036_v6 = vld [vmem:[%s1354_s7] ss:$0 sm:$0xff] }
 0x2ea   : > { %1089 = vmatpush3.bf16.msra.mxu0 %v661_v7  ;;  %1090 = vmatprep.mubr.msk.bf16.mxu0 %vm1163_vm0, %v1162_v0 }
 0x2eb   : > { %1100 = vmatprep.subr.bf16.mxu0 %v1162_v0 }
 0x2ec   : > { %425 = vadd.xlane.f32.xlu1 %v424_v8 }
 0x2ee   : > { %v1141_v10 = vpop.eup %1140 }
 0x2ef   : > { %v651_v12 = vsel %vm363_vm1, %v1141_v10, 0.0  ;;  %v654_v13 = vpack.c.bf16 %v1141_v10, %v1141_v10 }
 0x2f0   : > { %652 = vadd.xlane.f32.xlu0 %v651_v12 }
 0x2f1   : > { %1091 = vmatmul.mubr.msk.bf16.vlgmr.msra.gmra.mxu0 %vm363_vm1, %v654_v13 }
 0x2f2   : > { %1101 = vmatpush3.bf16.msra.mxu0 %v773_v11  ;;  %1102 = vmatprep.mubr.msk.bf16.mxu0 %vm1163_vm0, %v1162_v0 }
 0x2f6   : > { %v1143_v14 = vpop.eup %1142 }
 0x2f7   : > { %v763_v15 = vsel %vm363_vm1, %v1143_v14, 0.0  ;;  %v766_v16 = vpack.c.bf16 %v1143_v14, %v1143_v14 }
 0x2f8   : > { %764 = vadd.xlane.f32.xlu0 %v763_v15 }
 0x2f9   : > { %1103 = vmatmul.mubr.msk.bf16.vlgmr.msra.gmra.mxu0 %vm363_vm1, %v766_v16 }
 0x371   : > { %v541_v17 = vpop.xlane.xlu1 %540 }
 0x372   : > { %1144 = vrcp.f32 %v541_v17 }
 0x375   : > { %v426_v40 = vpop.xlane.xlu1 %425 }
 0x379   : > { %v653_v18 = vpop.xlane.xlu0 %652 }
 0x37a   : > { %1146 = vrcp.f32 %v653_v18 }
 0x37f   : > { %v1145_v20 = vpop.eup %1144 }
 0x381   : > { %v765_v21 = vpop.xlane.xlu0 %764 }
 0x382   : > { %1148 = vrcp.f32 %v765_v21 }
 0x383   : > { %1150 = vrcp.f32 %v426_v40 }
 0x387   : > { %v1147_v28 = vpop.eup %1146 }
 0x38f   : > { %v1149_v0 = vpop.eup %1148 }
 0x390   : > { %v1151_v41 = vpop.eup %1150 }
 0x391   : > { %v479_v44 = vmul.f32 %v1151_v41, %v1286_v30 }
 0x3a9   : > { %v585_v22 = vpop.f32.mrf.mxu0 }
 0x3aa   : > { %v592_v23 = vmul.f32 %v1145_v20, %v585_v22 }
 0x3ab   : > { %v1080_v24 = vpop.f32.mrf.mxu0 }
 0x3ac   : > { %818 = vrot.lane.b32.xlu0 %v592_v23, %s1171_s26 }
 0x3ad   : > { %v588_v25 = vpop.f32.mrf.mxu0 }
 0x3af   : > { %v1081_v27 = vpop.f32.mrf.mxu0 }
 0x3b1   : > { %v697_v29 = vpop.f32.mrf.mxu0 }
 0x3b2   : > { %v704_v31 = vmul.f32 %v1147_v28, %v697_v29 }
 0x3b3   : > { %v1092_v32 = vpop.f32.mrf.mxu0 }
 0x3b4   : > { %822 = vrot.lane.b32.xlu1 %v704_v31, %s1172_s9 }
 0x3b5   : > { %v700_v33 = vpop.f32.mrf.mxu0 }
 0x3b7   : > { %v1093_v34 = vpop.f32.mrf.mxu0 }
 0x3b9   : > { %v809_v35 = vpop.f32.mrf.mxu0 }
 0x3ba   : > { %v816_v36 = vmul.f32 %v1149_v0, %v809_v35 }
 0x3bb   : > { %v1104_v37 = vpop.f32.mrf.mxu0 }
 0x3bc   : > { %826 = vrot.lane.b32.xlu1 %v816_v36, %s1173_s10 }
 0x3bd   : > { %v812_v38 = vpop.f32.mrf.mxu0 }
 0x3bf   : > { %v1105_v39 = vpop.f32.mrf.mxu0 }
 0x41e   : > { %v819_v42 = vpop.permute.xlu0 %818 }
 0x41f   : > { %v829_v45 = vsel %vm363_vm1, %v479_v44, %v819_v42 }
 0x426   : > { %v823_v43 = vpop.permute.xlu1 %822 }
 0x427   : > { %v831_v46 = vsel %vm830_vm3, %v829_v45, %v823_v43 }
 0x42e   : > { %v827_v47 = vpop.permute.xlu1 %826 }
 0x42f   : > { %v833_v48 = vsel %vm832_vm4, %v831_v46, %v827_v47 }
 0x430   : > { %v834_v49 = vpack.c.bf16 %v833_v48, %v833_v48 }
 0x432   : > { %1111 = vmatmul.mubr.msk.bf16.vlgmr.msra.gmra.mxu1 %vm853_vm5, %v834_v49 }
 0x4f2   : > { %v891_v30 = vpop.f32.mrf.mxu1 }
 0x4f3   : > { %v892_v52 = vadd.f32 %v1031_v50, %v891_v30 }
 0x4f4   : > { %v1112_v53 = vpop.f32.mrf.mxu1 }
 0x4f5   : > { %v897_v54 = vadd.f32 %v892_v52, %v353_v51 }
 0x4f6   : > { %v894_v55 = vpop.f32.mrf.mxu1 }
 0x4f7   : > { %v898_v56 = vsel %vm853_vm5, %v897_v54, 0.0 }
 0x4f8   : > { %899 = vadd.xlane.f32.xlu0 %v898_v56  ;;  %v1113_v57 = vpop.f32.mrf.mxu1 }
 0x581   : > { %v900_v58 = vpop.xlane.xlu0 %899 }
 0x582   : > { %v902_v59 = vmul.f32 0.03125, %v900_v58 }
 0x584   : > { %v903_v60 = vsub.f32 %v897_v54, %v902_v59 }
 0x586   : > { %v904_v61 = vmul.f32 %v903_v60, %v903_v60 }
 0x588   : > { %v905_v62 = vsel %vm853_vm5, %v904_v61, 0.0 }
 0x589   : > { %906 = vadd.xlane.f32.xlu1 %v905_v62 }
 0x612   : > { %v907_v63 = vpop.xlane.xlu1 %906 }
 0x613   : > { %v908_v1 = vmul.f32 0.03125, %v907_v63 }
 0x615   : > { %v909_v3 = vadd.f32 1e-05, %v908_v1 }
 0x617   : > { %1152 = vrsqrt.f32 %v909_v3 }
 0x624   : > { %v1153_v4 = vpop.eup %1152 }
 0x625   : > { %v911_v5 = vmul.f32 %v1153_v4, %v903_v60 }
 0x627   : > { %v918_v7 = vmul.f32 %v1035_v2, %v911_v5 }
 0x629   : > { %v925_v8 = vadd.f32 %v1036_v6, %v918_v7 }
 0x62b   : > { %926 = vst.msk [vmem:[%s348_s22] sm:$0xff] %vm853_vm5, %v925_v8 }
 0x62c PF: > { %s18_s27 = sadd.s32 1, %s1160_s27  }
 0x62d   : > { %p15_p4 = scmp.ge.s32.totalorder %s18_s27, 4  }
 0x62f   :  { %17 = sbr.rel (!%p15_p4) target bundleno = 1 (0x1), region = 91 }

</bundles_post_ra>
